<compile_context>
chip_gen: v5e
topology: v5e:2x2
jax: 0.10.0
libtpu: 0.0.40
codegen_flags: <defaults>
</compile_context>

<pallas_src>
import functools

import jax
import jax.numpy as jnp
from jax.experimental import pallas as pl
from jax.experimental.pallas import tpu as pltpu


def _fused_lstm_fc_kernel(*refs, num_layers, hidden, seq_len, tile_b):
    # refs layout: x_tile, (w_ih_t, w_hh_t, bias) * num_layers, fc_w, fc_b, out, gates_scratch
    x_ref = refs[0]                                   # (T*tb, D_in)  time-major rows
    layer_refs = refs[1:1 + 3 * num_layers]
    fc_w_ref = refs[1 + 3 * num_layers]
    fc_b_ref = refs[2 + 3 * num_layers]
    out_ref = refs[3 + 3 * num_layers]
    gates_ref = refs[4 + 3 * num_layers]              # VMEM scratch (T*tb, 4H), f32, lane-dense

    T, H, tb = seq_len, hidden, tile_b

    def mm(a, w):
        # MXU matmul: operands in the weight dtype (bf16 by default), f32 accumulation.
        return jnp.dot(a.astype(w.dtype), w, preferred_element_type=jnp.float32)

    # Layer-0 hoisted input projection for the whole sequence (one MXU burst, off the
    # serial recurrence).  Row block [t*tb, (t+1)*tb) of gates_ref == timestep t.
    gates_ref[...] = mm(x_ref[...], layer_refs[0][...]) + layer_refs[2][...]

    h_last = None
    for layer in range(num_layers):
        w_hh = layer_refs[3 * layer + 1][...]          # (H, 4H)
        last_layer = layer == num_layers - 1
        if not last_layer:
            w_ih_next = layer_refs[3 * (layer + 1)][...]       # (H, 4H)
            b_next = layer_refs[3 * (layer + 1) + 2][...]      # (1, 4H)

        h = jnp.zeros((tb, H), jnp.float32)
        c = jnp.zeros((tb, H), jnp.float32)

        # Statically unrolled recurrence (T is small).
        # TODO(synk): for large T switch to lax.fori_loop over the gates scratch to keep
        #             vreg pressure / code size constant.
        for t in range(T):
            # Per-step serial path: one (tb,H)x(H,4H) MXU call + gate math.
            gates = gates_ref[pl.ds(t * tb, tb), :] + mm(h, w_hh)     # (tb, 4H) f32
            # One sigmoid + one tanh pass over the full lane-dense (tb, 4H=128) tile,
            # gates sliced from those results.  (For 4H > 128 lanes, reorder gates to
            # [i,f,o,g] at param-prep time and split the transcendental passes.)
            sig = jax.nn.sigmoid(gates)
            tnh = jnp.tanh(gates)
            i_g = sig[:, 0 * H:1 * H]
            f_g = sig[:, 1 * H:2 * H]
            g_g = tnh[:, 2 * H:3 * H]
            o_g = sig[:, 3 * H:4 * H]
            c = f_g * c + i_g * g_g
            h = o_g * jnp.tanh(c)
            if not last_layer:
                # Interleave the NEXT layer's input projection (MXU filler under the gate
                # math) and store it lane-dense; overwrites this step's consumed gate rows.
                gates_ref[pl.ds(t * tb, tb), :] = mm(h, w_ih_next) + b_next
        h_last = h

    # dropout(p=0.5) is identity in eval mode; fused final Linear epilogue.
    out_ref[...] = (mm(h_last, fc_w_ref[...]) + fc_b_ref[...]).astype(out_ref.dtype)


def lstm_model_forward(params, x, *, matmul_dtype=jnp.bfloat16):
    """Equivalent of LSTMModel.forward (eval mode). x: (B, T, D) -> (B, num_outputs)."""
    B, T, D = x.shape
    lstm_params = params["lstm"]
    L = len(lstm_params)
    H = lstm_params[0]["w_hh_t"].shape[0]
    O = params["fc"]["w_t"].shape[1]

    # Batch-tile grid: two parallel tiles once the batch is large enough (feeds both
    # TensorCores on v7x); otherwise a single tile (v5e/v6e or small B).
    if B >= 16 and B % 16 == 0:
        tb = B // 2
    else:
        tb = B
    nb = B // tb

    # Wrapper-side layout plumbing: per batch-tile, time-major flattened rows so each
    # timestep's gate tile in the kernel is one contiguous, lane-dense row block.
    x_tm = jnp.transpose(x.astype(jnp.float32), (1, 0, 2))                   # (T, B, D)
    x_tiles = (x_tm.reshape(T, nb, tb, D)
                   .transpose(1, 0, 2, 3)
                   .reshape(nb, T * tb, D))                                  # (nb, T*tb, D)

    flat_inputs = [x_tiles]
    in_specs = [pl.BlockSpec((None, T * tb, D), lambda i: (i, 0, 0))]
    for lp in lstm_params:
        w_ih = lp["w_ih_t"].astype(matmul_dtype)        # (D_in, 4H)
        w_hh = lp["w_hh_t"].astype(matmul_dtype)        # (H, 4H)
        b = lp["bias"].reshape(1, 4 * H).astype(jnp.float32)
        flat_inputs += [w_ih, w_hh, b]
        in_specs += [pl.BlockSpec(w_ih.shape, lambda i: (0, 0)),
                     pl.BlockSpec(w_hh.shape, lambda i: (0, 0)),
                     pl.BlockSpec(b.shape, lambda i: (0, 0))]
    fc_w = params["fc"]["w_t"].astype(matmul_dtype)     # (H, O)
    fc_b = params["fc"]["b"].reshape(1, O).astype(jnp.float32)
    flat_inputs += [fc_w, fc_b]
    in_specs += [pl.BlockSpec(fc_w.shape, lambda i: (0, 0)),
                 pl.BlockSpec(fc_b.shape, lambda i: (0, 0))]

    kernel = functools.partial(
        _fused_lstm_fc_kernel, num_layers=L, hidden=H, seq_len=T, tile_b=tb)

    return pl.pallas_call(
        kernel,
        out_shape=jax.ShapeDtypeStruct((B, O), jnp.float32),
        grid=(nb,),
        in_specs=in_specs,
        out_specs=pl.BlockSpec((tb, O), lambda i: (i, 0)),
        scratch_shapes=[pltpu.VMEM((T * tb, 4 * H), jnp.float32)],
        compiler_params=pltpu.CompilerParams(
            dimension_semantics=("parallel",),
            vmem_limit_bytes=32 * 1024 * 1024),
    )(*flat_inputs)


def init_params(key, input_size, hidden_size, num_layers, num_outputs):
    """Deterministic init matching PyTorch shapes (uniform(-1/sqrt(H), 1/sqrt(H)))."""
    params = {"lstm": [], "fc": {}}
    k = 1.0 / jnp.sqrt(hidden_size)
    for layer in range(num_layers):
        d_in = input_size if layer == 0 else hidden_size
        key, k1, k2, k3, k4 = jax.random.split(key, 5)
        w_ih = jax.random.uniform(k1, (4 * hidden_size, d_in), jnp.float32, -k, k)
        w_hh = jax.random.uniform(k2, (4 * hidden_size, hidden_size), jnp.float32, -k, k)
        b_ih = jax.random.uniform(k3, (4 * hidden_size,), jnp.float32, -k, k)
        b_hh = jax.random.uniform(k4, (4 * hidden_size,), jnp.float32, -k, k)
        params["lstm"].append({
            "w_ih_t": w_ih.T,            # (D_in, 4H)
            "w_hh_t": w_hh.T,            # (H, 4H)
            "bias": b_ih + b_hh,         # (4H,)
        })
    key, k1, k2 = jax.random.split(key, 3)
    kf = 1.0 / jnp.sqrt(hidden_size)
    fc_w = jax.random.uniform(k1, (num_outputs, hidden_size), jnp.float32, -kf, kf)
    fc_b = jax.random.uniform(k2, (num_outputs,), jnp.float32, -kf, kf)
    params["fc"] = {"w_t": fc_w.T, "b": fc_b}
    return params


def lstm_model_reference(params, x):
    """Pure-JAX reference for sanity checking."""
    h_seq = x
    for lp in params["lstm"]:
        B, T, _ = h_seq.shape
        H = lp["w_hh_t"].shape[0]
        h = jnp.zeros((B, H), jnp.float32)
        c = jnp.zeros((B, H), jnp.float32)
        outs = []
        for t in range(T):
            gates = h_seq[:, t, :] @ lp["w_ih_t"] + h @ lp["w_hh_t"] + lp["bias"]
            i_g = jax.nn.sigmoid(gates[:, 0 * H:1 * H])
            f_g = jax.nn.sigmoid(gates[:, 1 * H:2 * H])
            g_g = jnp.tanh(gates[:, 2 * H:3 * H])
            o_g = jax.nn.sigmoid(gates[:, 3 * H:4 * H])
            c = f_g * c + i_g * g_g
            h = o_g * jnp.tanh(c)
            outs.append(h)
        h_seq = jnp.stack(outs, axis=1)
    return h_seq[:, -1, :] @ params["fc"]["w_t"] + params["fc"]["b"]


if __name__ == "__main__":
    INPUT_SIZE = 16
    HIDDEN_SIZE = 32
    NUM_LAYERS = 2
    NUM_OUTPUTS = 8
    BATCH = 8
    SEQ = 8

    key = jax.random.PRNGKey(0)
    key, xkey = jax.random.split(key)
    x = jax.random.normal(xkey, (BATCH, SEQ, INPUT_SIZE), jnp.float32)

    params = init_params(key, INPUT_SIZE, HIDDEN_SIZE, NUM_LAYERS, NUM_OUTPUTS)

    ref = lstm_model_reference(params, x)

    # Exact path (f32 MXU operands): tight tolerance vs. the f32 reference.
    out_f32 = jax.jit(functools.partial(lstm_model_forward, matmul_dtype=jnp.float32))(params, x)
    out_f32 = jax.block_until_ready(out_f32)
    assert out_f32.shape == (BATCH, NUM_OUTPUTS)
    assert jnp.allclose(out_f32, ref, atol=1e-5, rtol=1e-5)

    # Default fast path (bf16 MXU operands, f32 accumulation / gate / state math):
    # looser tolerance for bf16 operand rounding.
    out_bf16 = jax.jit(lstm_model_forward)(params, x)
    out_bf16 = jax.block_until_ready(out_bf16)
    assert out_bf16.shape == (BATCH, NUM_OUTPUTS)
    assert jnp.allclose(out_bf16, ref, atol=6e-2, rtol=0)

    print("KERNEL_OK")
</pallas_src>

<mosaic_0001>
module attributes {stable_mosaic.version = 11 : i64} {
  func.func @_fused_lstm_fc_kernel(%arg0: i32, %arg1: memref<1x64x16xf32, #tpu.memory_space<vmem>>, %arg2: memref<16x128xf32, #tpu.memory_space<vmem>>, %arg3: memref<32x128xf32, #tpu.memory_space<vmem>>, %arg4: memref<1x128xf32, #tpu.memory_space<vmem>>, %arg5: memref<32x128xf32, #tpu.memory_space<vmem>>, %arg6: memref<32x128xf32, #tpu.memory_space<vmem>>, %arg7: memref<1x128xf32, #tpu.memory_space<vmem>>, %arg8: memref<32x8xf32, #tpu.memory_space<vmem>>, %arg9: memref<1x8xf32, #tpu.memory_space<vmem>>, %arg10: memref<8x8xf32, #tpu.memory_space<vmem>>, %arg11: memref<64x128xf32, #tpu.memory_space<vmem>>) attributes {dimension_semantics = [#tpu.dimension_semantics<parallel>], iteration_bounds = array<i64: 1>, scalar_prefetch = 0 : i64, scratch_operands = 1 : i64, tpu.core_type = #tpu.core_type<tc>, window_params = [{transform_indices = @transform_0, window_bounds = array<i64: 1, 64, 16>}, {pipeline_mode = #tpu.pipeline_mode<synchronous>, transform_indices = @transform_1, window_bounds = array<i64: 16, 128>}, {pipeline_mode = #tpu.pipeline_mode<synchronous>, transform_indices = @transform_2, window_bounds = array<i64: 32, 128>}, {pipeline_mode = #tpu.pipeline_mode<synchronous>, transform_indices = @transform_3, window_bounds = array<i64: 1, 128>}, {pipeline_mode = #tpu.pipeline_mode<synchronous>, transform_indices = @transform_4, window_bounds = array<i64: 32, 128>}, {pipeline_mode = #tpu.pipeline_mode<synchronous>, transform_indices = @transform_5, window_bounds = array<i64: 32, 128>}, {pipeline_mode = #tpu.pipeline_mode<synchronous>, transform_indices = @transform_6, window_bounds = array<i64: 1, 128>}, {pipeline_mode = #tpu.pipeline_mode<synchronous>, transform_indices = @transform_7, window_bounds = array<i64: 32, 8>}, {pipeline_mode = #tpu.pipeline_mode<synchronous>, transform_indices = @transform_8, window_bounds = array<i64: 1, 8>}, {transform_indices = @transform_9, window_bounds = array<i64: 8, 8>}]} {
    %c0 = arith.constant 0 : index
    %c0_0 = arith.constant 0 : index
    %c0_1 = arith.constant 0 : index
    %0 = vector.load %arg1[%c0, %c0_0, %c0_1] : memref<1x64x16xf32, #tpu.memory_space<vmem>>, vector<1x64x16xf32>
    %1 = vector.shape_cast %0 : vector<1x64x16xf32> to vector<64x16xf32>
    %c0_2 = arith.constant 0 : index
    %c0_3 = arith.constant 0 : index
    %2 = vector.load %arg2[%c0_2, %c0_3] : memref<16x128xf32, #tpu.memory_space<vmem>>, vector<16x128xf32>
    %cst = arith.constant dense<0.000000e+00> : vector<64x128xf32>
    %3 = tpu.matmul %1, %2, %cst {dimension_numbers = #tpu.dot_dimension_numbers<[1], [0], [0], [1], [0, 0, 1, 1], [], []>} : vector<64x16xf32>, vector<16x128xf32>, vector<64x128xf32> -> vector<64x128xf32>
    %c0_4 = arith.constant 0 : index
    %c0_5 = arith.constant 0 : index
    %4 = vector.load %arg4[%c0_4, %c0_5] : memref<1x128xf32, #tpu.memory_space<vmem>>, vector<1x128xf32>
    %5 = vector.broadcast %4 : vector<1x128xf32> to vector<64x128xf32>
    %6 = arith.addf %3, %5 : vector<64x128xf32>
    %c0_6 = arith.constant 0 : index
    %c0_7 = arith.constant 0 : index
    %7 = vector.load %arg11[%c0_6, %c0_7] : memref<64x128xf32, #tpu.memory_space<vmem>>, vector<64x128xf32>
    tpu.vector_store %arg11[%c0_6, %c0_7], %6 {strides = array<i32>} : memref<64x128xf32, #tpu.memory_space<vmem>>, vector<64x128xf32>,
    %c0_8 = arith.constant 0 : index
    %c0_9 = arith.constant 0 : index
    %8 = vector.load %arg3[%c0_8, %c0_9] : memref<32x128xf32, #tpu.memory_space<vmem>>, vector<32x128xf32>
    %c0_10 = arith.constant 0 : index
    %c0_11 = arith.constant 0 : index
    %9 = vector.load %arg5[%c0_10, %c0_11] : memref<32x128xf32, #tpu.memory_space<vmem>>, vector<32x128xf32>
    %c0_12 = arith.constant 0 : index
    %c0_13 = arith.constant 0 : index
    %10 = vector.load %arg7[%c0_12, %c0_13] : memref<1x128xf32, #tpu.memory_space<vmem>>, vector<1x128xf32>
    %cst_14 = arith.constant 0.000000e+00 : f32
    %11 = vector.broadcast %cst_14 : f32 to vector<8x32xf32>
    %cst_15 = arith.constant 0.000000e+00 : f32
    %12 = vector.broadcast %cst_15 : f32 to vector<8x32xf32>
    %c0_16 = arith.constant 0 : index
    %c0_17 = arith.constant 0 : index
    %13 = vector.load %arg11[%c0_16, %c0_17] : memref<64x128xf32, #tpu.memory_space<vmem>>, vector<8x128xf32>
    %cst_18 = arith.constant dense<0.000000e+00> : vector<8x128xf32>
    %14 = tpu.matmul %11, %8, %cst_18 {dimension_numbers = #tpu.dot_dimension_numbers<[1], [0], [0], [1], [0, 0, 1, 1], [], []>} : vector<8x32xf32>, vector<32x128xf32>, vector<8x128xf32> -> vector<8x128xf32>
    %15 = arith.addf %13, %14 : vector<8x128xf32>
    %16 = arith.negf %15 : vector<8x128xf32>
    %17 = math.exp %16 : vector<8x128xf32>
    %cst_19 = arith.constant 1.000000e+00 : f32
    %18 = vector.broadcast %cst_19 : f32 to vector<8x128xf32>
    %19 = arith.addf %18, %17 : vector<8x128xf32>
    %20 = arith.divf %18, %19 : vector<8x128xf32>
    %21 = math.tanh %15 : vector<8x128xf32>
    %22 = vector.extract_strided_slice %20 {offsets = [0, 0], sizes = [8, 32], strides = [1, 1]} : vector<8x128xf32> to vector<8x32xf32>
    %23 = vector.extract_strided_slice %20 {offsets = [0, 32], sizes = [8, 32], strides = [1, 1]} : vector<8x128xf32> to vector<8x32xf32>
    %24 = vector.extract_strided_slice %21 {offsets = [0, 64], sizes = [8, 32], strides = [1, 1]} : vector<8x128xf32> to vector<8x32xf32>
    %25 = vector.extract_strided_slice %20 {offsets = [0, 96], sizes = [8, 32], strides = [1, 1]} : vector<8x128xf32> to vector<8x32xf32>
    %26 = arith.mulf %23, %12 : vector<8x32xf32>
    %27 = arith.mulf %22, %24 : vector<8x32xf32>
    %28 = arith.addf %26, %27 : vector<8x32xf32>
    %29 = math.tanh %28 : vector<8x32xf32>
    %30 = arith.mulf %25, %29 : vector<8x32xf32>
    %cst_20 = arith.constant dense<0.000000e+00> : vector<8x128xf32>
    %31 = tpu.matmul %30, %9, %cst_20 {dimension_numbers = #tpu.dot_dimension_numbers<[1], [0], [0], [1], [0, 0, 1, 1], [], []>} : vector<8x32xf32>, vector<32x128xf32>, vector<8x128xf32> -> vector<8x128xf32>
    %32 = vector.broadcast %10 : vector<1x128xf32> to vector<8x128xf32>
    %33 = arith.addf %31, %32 : vector<8x128xf32>
    %c0_21 = arith.constant 0 : index
    %c0_22 = arith.constant 0 : index
    %34 = vector.load %arg11[%c0_21, %c0_22] : memref<64x128xf32, #tpu.memory_space<vmem>>, vector<8x128xf32>
    tpu.vector_store %arg11[%c0_21, %c0_22], %33 {strides = array<i32>} : memref<64x128xf32, #tpu.memory_space<vmem>>, vector<8x128xf32>,
    %c8 = arith.constant 8 : index
    %c0_23 = arith.constant 0 : index
    %35 = vector.load %arg11[%c8, %c0_23] : memref<64x128xf32, #tpu.memory_space<vmem>>, vector<8x128xf32>
    %cst_24 = arith.constant dense<0.000000e+00> : vector<8x128xf32>
    %36 = tpu.matmul %30, %8, %cst_24 {dimension_numbers = #tpu.dot_dimension_numbers<[1], [0], [0], [1], [0, 0, 1, 1], [], []>} : vector<8x32xf32>, vector<32x128xf32>, vector<8x128xf32> -> vector<8x128xf32>
    %37 = arith.addf %35, %36 : vector<8x128xf32>
    %38 = arith.negf %37 : vector<8x128xf32>
    %39 = math.exp %38 : vector<8x128xf32>
    %cst_25 = arith.constant 1.000000e+00 : f32
    %40 = vector.broadcast %cst_25 : f32 to vector<8x128xf32>
    %41 = arith.addf %40, %39 : vector<8x128xf32>
    %42 = arith.divf %40, %41 : vector<8x128xf32>
    %43 = math.tanh %37 : vector<8x128xf32>
    %44 = vector.extract_strided_slice %42 {offsets = [0, 0], sizes = [8, 32], strides = [1, 1]} : vector<8x128xf32> to vector<8x32xf32>
    %45 = vector.extract_strided_slice %42 {offsets = [0, 32], sizes = [8, 32], strides = [1, 1]} : vector<8x128xf32> to vector<8x32xf32>
    %46 = vector.extract_strided_slice %43 {offsets = [0, 64], sizes = [8, 32], strides = [1, 1]} : vector<8x128xf32> to vector<8x32xf32>
    %47 = vector.extract_strided_slice %42 {offsets = [0, 96], sizes = [8, 32], strides = [1, 1]} : vector<8x128xf32> to vector<8x32xf32>
    %48 = arith.mulf %45, %28 : vector<8x32xf32>
    %49 = arith.mulf %44, %46 : vector<8x32xf32>
    %50 = arith.addf %48, %49 : vector<8x32xf32>
    %51 = math.tanh %50 : vector<8x32xf32>
    %52 = arith.mulf %47, %51 : vector<8x32xf32>
    %cst_26 = arith.constant dense<0.000000e+00> : vector<8x128xf32>
    %53 = tpu.matmul %52, %9, %cst_26 {dimension_numbers = #tpu.dot_dimension_numbers<[1], [0], [0], [1], [0, 0, 1, 1], [], []>} : vector<8x32xf32>, vector<32x128xf32>, vector<8x128xf32> -> vector<8x128xf32>
    %54 = vector.broadcast %10 : vector<1x128xf32> to vector<8x128xf32>
    %55 = arith.addf %53, %54 : vector<8x128xf32>
    %c8_27 = arith.constant 8 : index
    %c0_28 = arith.constant 0 : index
    %56 = vector.load %arg11[%c8_27, %c0_28] : memref<64x128xf32, #tpu.memory_space<vmem>>, vector<8x128xf32>
    tpu.vector_store %arg11[%c8_27, %c0_28], %55 {strides = array<i32>} : memref<64x128xf32, #tpu.memory_space<vmem>>, vector<8x128xf32>,
    %c16 = arith.constant 16 : index
    %c0_29 = arith.constant 0 : index
    %57 = vector.load %arg11[%c16, %c0_29] : memref<64x128xf32, #tpu.memory_space<vmem>>, vector<8x128xf32>
    %cst_30 = arith.constant dense<0.000000e+00> : vector<8x128xf32>
    %58 = tpu.matmul %52, %8, %cst_30 {dimension_numbers = #tpu.dot_dimension_numbers<[1], [0], [0], [1], [0, 0, 1, 1], [], []>} : vector<8x32xf32>, vector<32x128xf32>, vector<8x128xf32> -> vector<8x128xf32>
    %59 = arith.addf %57, %58 : vector<8x128xf32>
    %60 = arith.negf %59 : vector<8x128xf32>
    %61 = math.exp %60 : vector<8x128xf32>
    %cst_31 = arith.constant 1.000000e+00 : f32
    %62 = vector.broadcast %cst_31 : f32 to vector<8x128xf32>
    %63 = arith.addf %62, %61 : vector<8x128xf32>
    %64 = arith.divf %62, %63 : vector<8x128xf32>
    %65 = math.tanh %59 : vector<8x128xf32>
    %66 = vector.extract_strided_slice %64 {offsets = [0, 0], sizes = [8, 32], strides = [1, 1]} : vector<8x128xf32> to vector<8x32xf32>
    %67 = vector.extract_strided_slice %64 {offsets = [0, 32], sizes = [8, 32], strides = [1, 1]} : vector<8x128xf32> to vector<8x32xf32>
    %68 = vector.extract_strided_slice %65 {offsets = [0, 64], sizes = [8, 32], strides = [1, 1]} : vector<8x128xf32> to vector<8x32xf32>
    %69 = vector.extract_strided_slice %64 {offsets = [0, 96], sizes = [8, 32], strides = [1, 1]} : vector<8x128xf32> to vector<8x32xf32>
    %70 = arith.mulf %67, %50 : vector<8x32xf32>
    %71 = arith.mulf %66, %68 : vector<8x32xf32>
    %72 = arith.addf %70, %71 : vector<8x32xf32>
    %73 = math.tanh %72 : vector<8x32xf32>
    %74 = arith.mulf %69, %73 : vector<8x32xf32>
    %cst_32 = arith.constant dense<0.000000e+00> : vector<8x128xf32>
    %75 = tpu.matmul %74, %9, %cst_32 {dimension_numbers = #tpu.dot_dimension_numbers<[1], [0], [0], [1], [0, 0, 1, 1], [], []>} : vector<8x32xf32>, vector<32x128xf32>, vector<8x128xf32> -> vector<8x128xf32>
    %76 = vector.broadcast %10 : vector<1x128xf32> to vector<8x128xf32>
    %77 = arith.addf %75, %76 : vector<8x128xf32>
    %c16_33 = arith.constant 16 : index
    %c0_34 = arith.constant 0 : index
    %78 = vector.load %arg11[%c16_33, %c0_34] : memref<64x128xf32, #tpu.memory_space<vmem>>, vector<8x128xf32>
    tpu.vector_store %arg11[%c16_33, %c0_34], %77 {strides = array<i32>} : memref<64x128xf32, #tpu.memory_space<vmem>>, vector<8x128xf32>,
    %c24 = arith.constant 24 : index
    %c0_35 = arith.constant 0 : index
    %79 = vector.load %arg11[%c24, %c0_35] : memref<64x128xf32, #tpu.memory_space<vmem>>, vector<8x128xf32>
    %cst_36 = arith.constant dense<0.000000e+00> : vector<8x128xf32>
    %80 = tpu.matmul %74, %8, %cst_36 {dimension_numbers = #tpu.dot_dimension_numbers<[1], [0], [0], [1], [0, 0, 1, 1], [], []>} : vector<8x32xf32>, vector<32x128xf32>, vector<8x128xf32> -> vector<8x128xf32>
    %81 = arith.addf %79, %80 : vector<8x128xf32>
    %82 = arith.negf %81 : vector<8x128xf32>
    %83 = math.exp %82 : vector<8x128xf32>
    %cst_37 = arith.constant 1.000000e+00 : f32
    %84 = vector.broadcast %cst_37 : f32 to vector<8x128xf32>
    %85 = arith.addf %84, %83 : vector<8x128xf32>
    %86 = arith.divf %84, %85 : vector<8x128xf32>
    %87 = math.tanh %81 : vector<8x128xf32>
    %88 = vector.extract_strided_slice %86 {offsets = [0, 0], sizes = [8, 32], strides = [1, 1]} : vector<8x128xf32> to vector<8x32xf32>
    %89 = vector.extract_strided_slice %86 {offsets = [0, 32], sizes = [8, 32], strides = [1, 1]} : vector<8x128xf32> to vector<8x32xf32>
    %90 = vector.extract_strided_slice %87 {offsets = [0, 64], sizes = [8, 32], strides = [1, 1]} : vector<8x128xf32> to vector<8x32xf32>
    %91 = vector.extract_strided_slice %86 {offsets = [0, 96], sizes = [8, 32], strides = [1, 1]} : vector<8x128xf32> to vector<8x32xf32>
    %92 = arith.mulf %89, %72 : vector<8x32xf32>
    %93 = arith.mulf %88, %90 : vector<8x32xf32>
    %94 = arith.addf %92, %93 : vector<8x32xf32>
    %95 = math.tanh %94 : vector<8x32xf32>
    %96 = arith.mulf %91, %95 : vector<8x32xf32>
    %cst_38 = arith.constant dense<0.000000e+00> : vector<8x128xf32>
    %97 = tpu.matmul %96, %9, %cst_38 {dimension_numbers = #tpu.dot_dimension_numbers<[1], [0], [0], [1], [0, 0, 1, 1], [], []>} : vector<8x32xf32>, vector<32x128xf32>, vector<8x128xf32> -> vector<8x128xf32>
    %98 = vector.broadcast %10 : vector<1x128xf32> to vector<8x128xf32>
    %99 = arith.addf %97, %98 : vector<8x128xf32>
    %c24_39 = arith.constant 24 : index
    %c0_40 = arith.constant 0 : index
    %100 = vector.load %arg11[%c24_39, %c0_40] : memref<64x128xf32, #tpu.memory_space<vmem>>, vector<8x128xf32>
    tpu.vector_store %arg11[%c24_39, %c0_40], %99 {strides = array<i32>} : memref<64x128xf32, #tpu.memory_space<vmem>>, vector<8x128xf32>,
    %c32 = arith.constant 32 : index
    %c0_41 = arith.constant 0 : index
    %101 = vector.load %arg11[%c32, %c0_41] : memref<64x128xf32, #tpu.memory_space<vmem>>, vector<8x128xf32>
    %cst_42 = arith.constant dense<0.000000e+00> : vector<8x128xf32>
    %102 = tpu.matmul %96, %8, %cst_42 {dimension_numbers = #tpu.dot_dimension_numbers<[1], [0], [0], [1], [0, 0, 1, 1], [], []>} : vector<8x32xf32>, vector<32x128xf32>, vector<8x128xf32> -> vector<8x128xf32>
    %103 = arith.addf %101, %102 : vector<8x128xf32>
    %104 = arith.negf %103 : vector<8x128xf32>
    %105 = math.exp %104 : vector<8x128xf32>
    %cst_43 = arith.constant 1.000000e+00 : f32
    %106 = vector.broadcast %cst_43 : f32 to vector<8x128xf32>
    %107 = arith.addf %106, %105 : vector<8x128xf32>
    %108 = arith.divf %106, %107 : vector<8x128xf32>
    %109 = math.tanh %103 : vector<8x128xf32>
    %110 = vector.extract_strided_slice %108 {offsets = [0, 0], sizes = [8, 32], strides = [1, 1]} : vector<8x128xf32> to vector<8x32xf32>
    %111 = vector.extract_strided_slice %108 {offsets = [0, 32], sizes = [8, 32], strides = [1, 1]} : vector<8x128xf32> to vector<8x32xf32>
    %112 = vector.extract_strided_slice %109 {offsets = [0, 64], sizes = [8, 32], strides = [1, 1]} : vector<8x128xf32> to vector<8x32xf32>
    %113 = vector.extract_strided_slice %108 {offsets = [0, 96], sizes = [8, 32], strides = [1, 1]} : vector<8x128xf32> to vector<8x32xf32>
    %114 = arith.mulf %111, %94 : vector<8x32xf32>
    %115 = arith.mulf %110, %112 : vector<8x32xf32>
    %116 = arith.addf %114, %115 : vector<8x32xf32>
    %117 = math.tanh %116 : vector<8x32xf32>
    %118 = arith.mulf %113, %117 : vector<8x32xf32>
    %cst_44 = arith.constant dense<0.000000e+00> : vector<8x128xf32>
    %119 = tpu.matmul %118, %9, %cst_44 {dimension_numbers = #tpu.dot_dimension_numbers<[1], [0], [0], [1], [0, 0, 1, 1], [], []>} : vector<8x32xf32>, vector<32x128xf32>, vector<8x128xf32> -> vector<8x128xf32>
    %120 = vector.broadcast %10 : vector<1x128xf32> to vector<8x128xf32>
    %121 = arith.addf %119, %120 : vector<8x128xf32>
    %c32_45 = arith.constant 32 : index
    %c0_46 = arith.constant 0 : index
    %122 = vector.load %arg11[%c32_45, %c0_46] : memref<64x128xf32, #tpu.memory_space<vmem>>, vector<8x128xf32>
    tpu.vector_store %arg11[%c32_45, %c0_46], %121 {strides = array<i32>} : memref<64x128xf32, #tpu.memory_space<vmem>>, vector<8x128xf32>,
    %c40 = arith.constant 40 : index
    %c0_47 = arith.constant 0 : index
    %123 = vector.load %arg11[%c40, %c0_47] : memref<64x128xf32, #tpu.memory_space<vmem>>, vector<8x128xf32>
    %cst_48 = arith.constant dense<0.000000e+00> : vector<8x128xf32>
    %124 = tpu.matmul %118, %8, %cst_48 {dimension_numbers = #tpu.dot_dimension_numbers<[1], [0], [0], [1], [0, 0, 1, 1], [], []>} : vector<8x32xf32>, vector<32x128xf32>, vector<8x128xf32> -> vector<8x128xf32>
    %125 = arith.addf %123, %124 : vector<8x128xf32>
    %126 = arith.negf %125 : vector<8x128xf32>
    %127 = math.exp %126 : vector<8x128xf32>
    %cst_49 = arith.constant 1.000000e+00 : f32
    %128 = vector.broadcast %cst_49 : f32 to vector<8x128xf32>
    %129 = arith.addf %128, %127 : vector<8x128xf32>
    %130 = arith.divf %128, %129 : vector<8x128xf32>
    %131 = math.tanh %125 : vector<8x128xf32>
    %132 = vector.extract_strided_slice %130 {offsets = [0, 0], sizes = [8, 32], strides = [1, 1]} : vector<8x128xf32> to vector<8x32xf32>
    %133 = vector.extract_strided_slice %130 {offsets = [0, 32], sizes = [8, 32], strides = [1, 1]} : vector<8x128xf32> to vector<8x32xf32>
    %134 = vector.extract_strided_slice %131 {offsets = [0, 64], sizes = [8, 32], strides = [1, 1]} : vector<8x128xf32> to vector<8x32xf32>
    %135 = vector.extract_strided_slice %130 {offsets = [0, 96], sizes = [8, 32], strides = [1, 1]} : vector<8x128xf32> to vector<8x32xf32>
    %136 = arith.mulf %133, %116 : vector<8x32xf32>
    %137 = arith.mulf %132, %134 : vector<8x32xf32>
    %138 = arith.addf %136, %137 : vector<8x32xf32>
    %139 = math.tanh %138 : vector<8x32xf32>
    %140 = arith.mulf %135, %139 : vector<8x32xf32>
    %cst_50 = arith.constant dense<0.000000e+00> : vector<8x128xf32>
    %141 = tpu.matmul %140, %9, %cst_50 {dimension_numbers = #tpu.dot_dimension_numbers<[1], [0], [0], [1], [0, 0, 1, 1], [], []>} : vector<8x32xf32>, vector<32x128xf32>, vector<8x128xf32> -> vector<8x128xf32>
    %142 = vector.broadcast %10 : vector<1x128xf32> to vector<8x128xf32>
    %143 = arith.addf %141, %142 : vector<8x128xf32>
    %c40_51 = arith.constant 40 : index
    %c0_52 = arith.constant 0 : index
    %144 = vector.load %arg11[%c40_51, %c0_52] : memref<64x128xf32, #tpu.memory_space<vmem>>, vector<8x128xf32>
    tpu.vector_store %arg11[%c40_51, %c0_52], %143 {strides = array<i32>} : memref<64x128xf32, #tpu.memory_space<vmem>>, vector<8x128xf32>,
    %c48 = arith.constant 48 : index
    %c0_53 = arith.constant 0 : index
    %145 = vector.load %arg11[%c48, %c0_53] : memref<64x128xf32, #tpu.memory_space<vmem>>, vector<8x128xf32>
    %cst_54 = arith.constant dense<0.000000e+00> : vector<8x128xf32>
    %146 = tpu.matmul %140, %8, %cst_54 {dimension_numbers = #tpu.dot_dimension_numbers<[1], [0], [0], [1], [0, 0, 1, 1], [], []>} : vector<8x32xf32>, vector<32x128xf32>, vector<8x128xf32> -> vector<8x128xf32>
    %147 = arith.addf %145, %146 : vector<8x128xf32>
    %148 = arith.negf %147 : vector<8x128xf32>
    %149 = math.exp %148 : vector<8x128xf32>
    %cst_55 = arith.constant 1.000000e+00 : f32
    %150 = vector.broadcast %cst_55 : f32 to vector<8x128xf32>
    %151 = arith.addf %150, %149 : vector<8x128xf32>
    %152 = arith.divf %150, %151 : vector<8x128xf32>
    %153 = math.tanh %147 : vector<8x128xf32>
    %154 = vector.extract_strided_slice %152 {offsets = [0, 0], sizes = [8, 32], strides = [1, 1]} : vector<8x128xf32> to vector<8x32xf32>
    %155 = vector.extract_strided_slice %152 {offsets = [0, 32], sizes = [8, 32], strides = [1, 1]} : vector<8x128xf32> to vector<8x32xf32>
    %156 = vector.extract_strided_slice %153 {offsets = [0, 64], sizes = [8, 32], strides = [1, 1]} : vector<8x128xf32> to vector<8x32xf32>
    %157 = vector.extract_strided_slice %152 {offsets = [0, 96], sizes = [8, 32], strides = [1, 1]} : vector<8x128xf32> to vector<8x32xf32>
    %158 = arith.mulf %155, %138 : vector<8x32xf32>
    %159 = arith.mulf %154, %156 : vector<8x32xf32>
    %160 = arith.addf %158, %159 : vector<8x32xf32>
    %161 = math.tanh %160 : vector<8x32xf32>
    %162 = arith.mulf %157, %161 : vector<8x32xf32>
    %cst_56 = arith.constant dense<0.000000e+00> : vector<8x128xf32>
    %163 = tpu.matmul %162, %9, %cst_56 {dimension_numbers = #tpu.dot_dimension_numbers<[1], [0], [0], [1], [0, 0, 1, 1], [], []>} : vector<8x32xf32>, vector<32x128xf32>, vector<8x128xf32> -> vector<8x128xf32>
    %164 = vector.broadcast %10 : vector<1x128xf32> to vector<8x128xf32>
    %165 = arith.addf %163, %164 : vector<8x128xf32>
    %c48_57 = arith.constant 48 : index
    %c0_58 = arith.constant 0 : index
    %166 = vector.load %arg11[%c48_57, %c0_58] : memref<64x128xf32, #tpu.memory_space<vmem>>, vector<8x128xf32>
    tpu.vector_store %arg11[%c48_57, %c0_58], %165 {strides = array<i32>} : memref<64x128xf32, #tpu.memory_space<vmem>>, vector<8x128xf32>,
    %c56 = arith.constant 56 : index
    %c0_59 = arith.constant 0 : index
    %167 = vector.load %arg11[%c56, %c0_59] : memref<64x128xf32, #tpu.memory_space<vmem>>, vector<8x128xf32>
    %cst_60 = arith.constant dense<0.000000e+00> : vector<8x128xf32>
    %168 = tpu.matmul %162, %8, %cst_60 {dimension_numbers = #tpu.dot_dimension_numbers<[1], [0], [0], [1], [0, 0, 1, 1], [], []>} : vector<8x32xf32>, vector<32x128xf32>, vector<8x128xf32> -> vector<8x128xf32>
    %169 = arith.addf %167, %168 : vector<8x128xf32>
    %170 = arith.negf %169 : vector<8x128xf32>
    %171 = math.exp %170 : vector<8x128xf32>
    %cst_61 = arith.constant 1.000000e+00 : f32
    %172 = vector.broadcast %cst_61 : f32 to vector<8x128xf32>
    %173 = arith.addf %172, %171 : vector<8x128xf32>
    %174 = arith.divf %172, %173 : vector<8x128xf32>
    %175 = math.tanh %169 : vector<8x128xf32>
    %176 = vector.extract_strided_slice %174 {offsets = [0, 0], sizes = [8, 32], strides = [1, 1]} : vector<8x128xf32> to vector<8x32xf32>
    %177 = vector.extract_strided_slice %174 {offsets = [0, 32], sizes = [8, 32], strides = [1, 1]} : vector<8x128xf32> to vector<8x32xf32>
    %178 = vector.extract_strided_slice %175 {offsets = [0, 64], sizes = [8, 32], strides = [1, 1]} : vector<8x128xf32> to vector<8x32xf32>
    %179 = vector.extract_strided_slice %174 {offsets = [0, 96], sizes = [8, 32], strides = [1, 1]} : vector<8x128xf32> to vector<8x32xf32>
    %180 = arith.mulf %177, %160 : vector<8x32xf32>
    %181 = arith.mulf %176, %178 : vector<8x32xf32>
    %182 = arith.addf %180, %181 : vector<8x32xf32>
    %183 = math.tanh %182 : vector<8x32xf32>
    %184 = arith.mulf %179, %183 : vector<8x32xf32>
    %cst_62 = arith.constant dense<0.000000e+00> : vector<8x128xf32>
    %185 = tpu.matmul %184, %9, %cst_62 {dimension_numbers = #tpu.dot_dimension_numbers<[1], [0], [0], [1], [0, 0, 1, 1], [], []>} : vector<8x32xf32>, vector<32x128xf32>, vector<8x128xf32> -> vector<8x128xf32>
    %186 = vector.broadcast %10 : vector<1x128xf32> to vector<8x128xf32>
    %187 = arith.addf %185, %186 : vector<8x128xf32>
    %c56_63 = arith.constant 56 : index
    %c0_64 = arith.constant 0 : index
    %188 = vector.load %arg11[%c56_63, %c0_64] : memref<64x128xf32, #tpu.memory_space<vmem>>, vector<8x128xf32>
    tpu.vector_store %arg11[%c56_63, %c0_64], %187 {strides = array<i32>} : memref<64x128xf32, #tpu.memory_space<vmem>>, vector<8x128xf32>,
    %c0_65 = arith.constant 0 : index
    %c0_66 = arith.constant 0 : index
    %189 = vector.load %arg6[%c0_65, %c0_66] : memref<32x128xf32, #tpu.memory_space<vmem>>, vector<32x128xf32>
    %cst_67 = arith.constant 0.000000e+00 : f32
    %190 = vector.broadcast %cst_67 : f32 to vector<8x32xf32>
    %cst_68 = arith.constant 0.000000e+00 : f32
    %191 = vector.broadcast %cst_68 : f32 to vector<8x32xf32>
    %c0_69 = arith.constant 0 : index
    %c0_70 = arith.constant 0 : index
    %192 = vector.load %arg11[%c0_69, %c0_70] : memref<64x128xf32, #tpu.memory_space<vmem>>, vector<8x128xf32>
    %cst_71 = arith.constant dense<0.000000e+00> : vector<8x128xf32>
    %193 = tpu.matmul %190, %189, %cst_71 {dimension_numbers = #tpu.dot_dimension_numbers<[1], [0], [0], [1], [0, 0, 1, 1], [], []>} : vector<8x32xf32>, vector<32x128xf32>, vector<8x128xf32> -> vector<8x128xf32>
    %194 = arith.addf %192, %193 : vector<8x128xf32>
    %195 = arith.negf %194 : vector<8x128xf32>
    %196 = math.exp %195 : vector<8x128xf32>
    %cst_72 = arith.constant 1.000000e+00 : f32
    %197 = vector.broadcast %cst_72 : f32 to vector<8x128xf32>
    %198 = arith.addf %197, %196 : vector<8x128xf32>
    %199 = arith.divf %197, %198 : vector<8x128xf32>
    %200 = math.tanh %194 : vector<8x128xf32>
    %201 = vector.extract_strided_slice %199 {offsets = [0, 0], sizes = [8, 32], strides = [1, 1]} : vector<8x128xf32> to vector<8x32xf32>
    %202 = vector.extract_strided_slice %199 {offsets = [0, 32], sizes = [8, 32], strides = [1, 1]} : vector<8x128xf32> to vector<8x32xf32>
    %203 = vector.extract_strided_slice %200 {offsets = [0, 64], sizes = [8, 32], strides = [1, 1]} : vector<8x128xf32> to vector<8x32xf32>
    %204 = vector.extract_strided_slice %199 {offsets = [0, 96], sizes = [8, 32], strides = [1, 1]} : vector<8x128xf32> to vector<8x32xf32>
    %205 = arith.mulf %202, %191 : vector<8x32xf32>
    %206 = arith.mulf %201, %203 : vector<8x32xf32>
    %207 = arith.addf %205, %206 : vector<8x32xf32>
    %208 = math.tanh %207 : vector<8x32xf32>
    %209 = arith.mulf %204, %208 : vector<8x32xf32>
    %c8_73 = arith.constant 8 : index
    %c0_74 = arith.constant 0 : index
    %210 = vector.load %arg11[%c8_73, %c0_74] : memref<64x128xf32, #tpu.memory_space<vmem>>, vector<8x128xf32>
    %cst_75 = arith.constant dense<0.000000e+00> : vector<8x128xf32>
    %211 = tpu.matmul %209, %189, %cst_75 {dimension_numbers = #tpu.dot_dimension_numbers<[1], [0], [0], [1], [0, 0, 1, 1], [], []>} : vector<8x32xf32>, vector<32x128xf32>, vector<8x128xf32> -> vector<8x128xf32>
    %212 = arith.addf %210, %211 : vector<8x128xf32>
    %213 = arith.negf %212 : vector<8x128xf32>
    %214 = math.exp %213 : vector<8x128xf32>
    %cst_76 = arith.constant 1.000000e+00 : f32
    %215 = vector.broadcast %cst_76 : f32 to vector<8x128xf32>
    %216 = arith.addf %215, %214 : vector<8x128xf32>
    %217 = arith.divf %215, %216 : vector<8x128xf32>
    %218 = math.tanh %212 : vector<8x128xf32>
    %219 = vector.extract_strided_slice %217 {offsets = [0, 0], sizes = [8, 32], strides = [1, 1]} : vector<8x128xf32> to vector<8x32xf32>
    %220 = vector.extract_strided_slice %217 {offsets = [0, 32], sizes = [8, 32], strides = [1, 1]} : vector<8x128xf32> to vector<8x32xf32>
    %221 = vector.extract_strided_slice %218 {offsets = [0, 64], sizes = [8, 32], strides = [1, 1]} : vector<8x128xf32> to vector<8x32xf32>
    %222 = vector.extract_strided_slice %217 {offsets = [0, 96], sizes = [8, 32], strides = [1, 1]} : vector<8x128xf32> to vector<8x32xf32>
    %223 = arith.mulf %220, %207 : vector<8x32xf32>
    %224 = arith.mulf %219, %221 : vector<8x32xf32>
    %225 = arith.addf %223, %224 : vector<8x32xf32>
    %226 = math.tanh %225 : vector<8x32xf32>
    %227 = arith.mulf %222, %226 : vector<8x32xf32>
    %c16_77 = arith.constant 16 : index
    %c0_78 = arith.constant 0 : index
    %228 = vector.load %arg11[%c16_77, %c0_78] : memref<64x128xf32, #tpu.memory_space<vmem>>, vector<8x128xf32>
    %cst_79 = arith.constant dense<0.000000e+00> : vector<8x128xf32>
    %229 = tpu.matmul %227, %189, %cst_79 {dimension_numbers = #tpu.dot_dimension_numbers<[1], [0], [0], [1], [0, 0, 1, 1], [], []>} : vector<8x32xf32>, vector<32x128xf32>, vector<8x128xf32> -> vector<8x128xf32>
    %230 = arith.addf %228, %229 : vector<8x128xf32>
    %231 = arith.negf %230 : vector<8x128xf32>
    %232 = math.exp %231 : vector<8x128xf32>
    %cst_80 = arith.constant 1.000000e+00 : f32
    %233 = vector.broadcast %cst_80 : f32 to vector<8x128xf32>
    %234 = arith.addf %233, %232 : vector<8x128xf32>
    %235 = arith.divf %233, %234 : vector<8x128xf32>
    %236 = math.tanh %230 : vector<8x128xf32>
    %237 = vector.extract_strided_slice %235 {offsets = [0, 0], sizes = [8, 32], strides = [1, 1]} : vector<8x128xf32> to vector<8x32xf32>
    %238 = vector.extract_strided_slice %235 {offsets = [0, 32], sizes = [8, 32], strides = [1, 1]} : vector<8x128xf32> to vector<8x32xf32>
    %239 = vector.extract_strided_slice %236 {offsets = [0, 64], sizes = [8, 32], strides = [1, 1]} : vector<8x128xf32> to vector<8x32xf32>
    %240 = vector.extract_strided_slice %235 {offsets = [0, 96], sizes = [8, 32], strides = [1, 1]} : vector<8x128xf32> to vector<8x32xf32>
    %241 = arith.mulf %238, %225 : vector<8x32xf32>
    %242 = arith.mulf %237, %239 : vector<8x32xf32>
    %243 = arith.addf %241, %242 : vector<8x32xf32>
    %244 = math.tanh %243 : vector<8x32xf32>
    %245 = arith.mulf %240, %244 : vector<8x32xf32>
    %c24_81 = arith.constant 24 : index
    %c0_82 = arith.constant 0 : index
    %246 = vector.load %arg11[%c24_81, %c0_82] : memref<64x128xf32, #tpu.memory_space<vmem>>, vector<8x128xf32>
    %cst_83 = arith.constant dense<0.000000e+00> : vector<8x128xf32>
    %247 = tpu.matmul %245, %189, %cst_83 {dimension_numbers = #tpu.dot_dimension_numbers<[1], [0], [0], [1], [0, 0, 1, 1], [], []>} : vector<8x32xf32>, vector<32x128xf32>, vector<8x128xf32> -> vector<8x128xf32>
    %248 = arith.addf %246, %247 : vector<8x128xf32>
    %249 = arith.negf %248 : vector<8x128xf32>
    %250 = math.exp %249 : vector<8x128xf32>
    %cst_84 = arith.constant 1.000000e+00 : f32
    %251 = vector.broadcast %cst_84 : f32 to vector<8x128xf32>
    %252 = arith.addf %251, %250 : vector<8x128xf32>
    %253 = arith.divf %251, %252 : vector<8x128xf32>
    %254 = math.tanh %248 : vector<8x128xf32>
    %255 = vector.extract_strided_slice %253 {offsets = [0, 0], sizes = [8, 32], strides = [1, 1]} : vector<8x128xf32> to vector<8x32xf32>
    %256 = vector.extract_strided_slice %253 {offsets = [0, 32], sizes = [8, 32], strides = [1, 1]} : vector<8x128xf32> to vector<8x32xf32>
    %257 = vector.extract_strided_slice %254 {offsets = [0, 64], sizes = [8, 32], strides = [1, 1]} : vector<8x128xf32> to vector<8x32xf32>
    %258 = vector.extract_strided_slice %253 {offsets = [0, 96], sizes = [8, 32], strides = [1, 1]} : vector<8x128xf32> to vector<8x32xf32>
    %259 = arith.mulf %256, %243 : vector<8x32xf32>
    %260 = arith.mulf %255, %257 : vector<8x32xf32>
    %261 = arith.addf %259, %260 : vector<8x32xf32>
    %262 = math.tanh %261 : vector<8x32xf32>
    %263 = arith.mulf %258, %262 : vector<8x32xf32>
    %c32_85 = arith.constant 32 : index
    %c0_86 = arith.constant 0 : index
    %264 = vector.load %arg11[%c32_85, %c0_86] : memref<64x128xf32, #tpu.memory_space<vmem>>, vector<8x128xf32>
    %cst_87 = arith.constant dense<0.000000e+00> : vector<8x128xf32>
    %265 = tpu.matmul %263, %189, %cst_87 {dimension_numbers = #tpu.dot_dimension_numbers<[1], [0], [0], [1], [0, 0, 1, 1], [], []>} : vector<8x32xf32>, vector<32x128xf32>, vector<8x128xf32> -> vector<8x128xf32>
    %266 = arith.addf %264, %265 : vector<8x128xf32>
    %267 = arith.negf %266 : vector<8x128xf32>
    %268 = math.exp %267 : vector<8x128xf32>
    %cst_88 = arith.constant 1.000000e+00 : f32
    %269 = vector.broadcast %cst_88 : f32 to vector<8x128xf32>
    %270 = arith.addf %269, %268 : vector<8x128xf32>
    %271 = arith.divf %269, %270 : vector<8x128xf32>
    %272 = math.tanh %266 : vector<8x128xf32>
    %273 = vector.extract_strided_slice %271 {offsets = [0, 0], sizes = [8, 32], strides = [1, 1]} : vector<8x128xf32> to vector<8x32xf32>
    %274 = vector.extract_strided_slice %271 {offsets = [0, 32], sizes = [8, 32], strides = [1, 1]} : vector<8x128xf32> to vector<8x32xf32>
    %275 = vector.extract_strided_slice %272 {offsets = [0, 64], sizes = [8, 32], strides = [1, 1]} : vector<8x128xf32> to vector<8x32xf32>
    %276 = vector.extract_strided_slice %271 {offsets = [0, 96], sizes = [8, 32], strides = [1, 1]} : vector<8x128xf32> to vector<8x32xf32>
    %277 = arith.mulf %274, %261 : vector<8x32xf32>
    %278 = arith.mulf %273, %275 : vector<8x32xf32>
    %279 = arith.addf %277, %278 : vector<8x32xf32>
    %280 = math.tanh %279 : vector<8x32xf32>
    %281 = arith.mulf %276, %280 : vector<8x32xf32>
    %c40_89 = arith.constant 40 : index
    %c0_90 = arith.constant 0 : index
    %282 = vector.load %arg11[%c40_89, %c0_90] : memref<64x128xf32, #tpu.memory_space<vmem>>, vector<8x128xf32>
    %cst_91 = arith.constant dense<0.000000e+00> : vector<8x128xf32>
    %283 = tpu.matmul %281, %189, %cst_91 {dimension_numbers = #tpu.dot_dimension_numbers<[1], [0], [0], [1], [0, 0, 1, 1], [], []>} : vector<8x32xf32>, vector<32x128xf32>, vector<8x128xf32> -> vector<8x128xf32>
    %284 = arith.addf %282, %283 : vector<8x128xf32>
    %285 = arith.negf %284 : vector<8x128xf32>
    %286 = math.exp %285 : vector<8x128xf32>
    %cst_92 = arith.constant 1.000000e+00 : f32
    %287 = vector.broadcast %cst_92 : f32 to vector<8x128xf32>
    %288 = arith.addf %287, %286 : vector<8x128xf32>
    %289 = arith.divf %287, %288 : vector<8x128xf32>
    %290 = math.tanh %284 : vector<8x128xf32>
    %291 = vector.extract_strided_slice %289 {offsets = [0, 0], sizes = [8, 32], strides = [1, 1]} : vector<8x128xf32> to vector<8x32xf32>
    %292 = vector.extract_strided_slice %289 {offsets = [0, 32], sizes = [8, 32], strides = [1, 1]} : vector<8x128xf32> to vector<8x32xf32>
    %293 = vector.extract_strided_slice %290 {offsets = [0, 64], sizes = [8, 32], strides = [1, 1]} : vector<8x128xf32> to vector<8x32xf32>
    %294 = vector.extract_strided_slice %289 {offsets = [0, 96], sizes = [8, 32], strides = [1, 1]} : vector<8x128xf32> to vector<8x32xf32>
    %295 = arith.mulf %292, %279 : vector<8x32xf32>
    %296 = arith.mulf %291, %293 : vector<8x32xf32>
    %297 = arith.addf %295, %296 : vector<8x32xf32>
    %298 = math.tanh %297 : vector<8x32xf32>
    %299 = arith.mulf %294, %298 : vector<8x32xf32>
    %c48_93 = arith.constant 48 : index
    %c0_94 = arith.constant 0 : index
    %300 = vector.load %arg11[%c48_93, %c0_94] : memref<64x128xf32, #tpu.memory_space<vmem>>, vector<8x128xf32>
    %cst_95 = arith.constant dense<0.000000e+00> : vector<8x128xf32>
    %301 = tpu.matmul %299, %189, %cst_95 {dimension_numbers = #tpu.dot_dimension_numbers<[1], [0], [0], [1], [0, 0, 1, 1], [], []>} : vector<8x32xf32>, vector<32x128xf32>, vector<8x128xf32> -> vector<8x128xf32>
    %302 = arith.addf %300, %301 : vector<8x128xf32>
    %303 = arith.negf %302 : vector<8x128xf32>
    %304 = math.exp %303 : vector<8x128xf32>
    %cst_96 = arith.constant 1.000000e+00 : f32
    %305 = vector.broadcast %cst_96 : f32 to vector<8x128xf32>
    %306 = arith.addf %305, %304 : vector<8x128xf32>
    %307 = arith.divf %305, %306 : vector<8x128xf32>
    %308 = math.tanh %302 : vector<8x128xf32>
    %309 = vector.extract_strided_slice %307 {offsets = [0, 0], sizes = [8, 32], strides = [1, 1]} : vector<8x128xf32> to vector<8x32xf32>
    %310 = vector.extract_strided_slice %307 {offsets = [0, 32], sizes = [8, 32], strides = [1, 1]} : vector<8x128xf32> to vector<8x32xf32>
    %311 = vector.extract_strided_slice %308 {offsets = [0, 64], sizes = [8, 32], strides = [1, 1]} : vector<8x128xf32> to vector<8x32xf32>
    %312 = vector.extract_strided_slice %307 {offsets = [0, 96], sizes = [8, 32], strides = [1, 1]} : vector<8x128xf32> to vector<8x32xf32>
    %313 = arith.mulf %310, %297 : vector<8x32xf32>
    %314 = arith.mulf %309, %311 : vector<8x32xf32>
    %315 = arith.addf %313, %314 : vector<8x32xf32>
    %316 = math.tanh %315 : vector<8x32xf32>
    %317 = arith.mulf %312, %316 : vector<8x32xf32>
    %c56_97 = arith.constant 56 : index
    %c0_98 = arith.constant 0 : index
    %318 = vector.load %arg11[%c56_97, %c0_98] : memref<64x128xf32, #tpu.memory_space<vmem>>, vector<8x128xf32>
    %cst_99 = arith.constant dense<0.000000e+00> : vector<8x128xf32>
    %319 = tpu.matmul %317, %189, %cst_99 {dimension_numbers = #tpu.dot_dimension_numbers<[1], [0], [0], [1], [0, 0, 1, 1], [], []>} : vector<8x32xf32>, vector<32x128xf32>, vector<8x128xf32> -> vector<8x128xf32>
    %320 = arith.addf %318, %319 : vector<8x128xf32>
    %321 = arith.negf %320 : vector<8x128xf32>
    %322 = math.exp %321 : vector<8x128xf32>
    %cst_100 = arith.constant 1.000000e+00 : f32
    %323 = vector.broadcast %cst_100 : f32 to vector<8x128xf32>
    %324 = arith.addf %323, %322 : vector<8x128xf32>
    %325 = arith.divf %323, %324 : vector<8x128xf32>
    %326 = math.tanh %320 : vector<8x128xf32>
    %327 = vector.extract_strided_slice %325 {offsets = [0, 0], sizes = [8, 32], strides = [1, 1]} : vector<8x128xf32> to vector<8x32xf32>
    %328 = vector.extract_strided_slice %325 {offsets = [0, 32], sizes = [8, 32], strides = [1, 1]} : vector<8x128xf32> to vector<8x32xf32>
    %329 = vector.extract_strided_slice %326 {offsets = [0, 64], sizes = [8, 32], strides = [1, 1]} : vector<8x128xf32> to vector<8x32xf32>
    %330 = vector.extract_strided_slice %325 {offsets = [0, 96], sizes = [8, 32], strides = [1, 1]} : vector<8x128xf32> to vector<8x32xf32>
    %331 = arith.mulf %328, %315 : vector<8x32xf32>
    %332 = arith.mulf %327, %329 : vector<8x32xf32>
    %333 = arith.addf %331, %332 : vector<8x32xf32>
    %334 = math.tanh %333 : vector<8x32xf32>
    %335 = arith.mulf %330, %334 : vector<8x32xf32>
    %c0_101 = arith.constant 0 : index
    %c0_102 = arith.constant 0 : index
    %336 = vector.load %arg8[%c0_101, %c0_102] : memref<32x8xf32, #tpu.memory_space<vmem>>, vector<32x8xf32>
    %cst_103 = arith.constant dense<0.000000e+00> : vector<8x8xf32>
    %337 = tpu.matmul %335, %336, %cst_103 {dimension_numbers = #tpu.dot_dimension_numbers<[1], [0], [0], [1], [0, 0, 1, 1], [], []>} : vector<8x32xf32>, vector<32x8xf32>, vector<8x8xf32> -> vector<8x8xf32>
    %c0_104 = arith.constant 0 : index
    %c0_105 = arith.constant 0 : index
    %338 = vector.load %arg9[%c0_104, %c0_105] : memref<1x8xf32, #tpu.memory_space<vmem>>, vector<1x8xf32>
    %339 = vector.broadcast %338 : vector<1x8xf32> to vector<8x8xf32>
    %340 = arith.addf %337, %339 : vector<8x8xf32>
    %c0_106 = arith.constant 0 : index
    %c0_107 = arith.constant 0 : index
    %341 = vector.load %arg10[%c0_106, %c0_107] : memref<8x8xf32, #tpu.memory_space<vmem>>, vector<8x8xf32>
    tpu.vector_store %arg10[%c0_106, %c0_107], %340 {strides = array<i32>} : memref<8x8xf32, #tpu.memory_space<vmem>>, vector<8x8xf32>,
    return
  }
  func.func @transform_0(%arg0: i32) -> (i32, i32, i32) {
    %c0_i32 = arith.constant 0 : i32
    %c0_i32_0 = arith.constant 0 : i32
    %c0_i32_1 = arith.constant 0 : i32
    return %arg0, %c0_i32, %c0_i32_0 : i32, i32, i32
  }
  func.func @transform_1(%arg0: i32) -> (i32, i32) {
    %c0_i32 = arith.constant 0 : i32
    %c0_i32_0 = arith.constant 0 : i32
    %c0_i32_1 = arith.constant 0 : i32
    return %c0_i32, %c0_i32_0 : i32, i32
  }
  func.func @transform_2(%arg0: i32) -> (i32, i32) {
    %c0_i32 = arith.constant 0 : i32
    %c0_i32_0 = arith.constant 0 : i32
    %c0_i32_1 = arith.constant 0 : i32
    return %c0_i32, %c0_i32_0 : i32, i32
  }
  func.func @transform_3(%arg0: i32) -> (i32, i32) {
    %c0_i32 = arith.constant 0 : i32
    %c0_i32_0 = arith.constant 0 : i32
    %c0_i32_1 = arith.constant 0 : i32
    return %c0_i32, %c0_i32_0 : i32, i32
  }
  func.func @transform_4(%arg0: i32) -> (i32, i32) {
    %c0_i32 = arith.constant 0 : i32
    %c0_i32_0 = arith.constant 0 : i32
    %c0_i32_1 = arith.constant 0 : i32
    return %c0_i32, %c0_i32_0 : i32, i32
  }
  func.func @transform_5(%arg0: i32) -> (i32, i32) {
    %c0_i32 = arith.constant 0 : i32
    %c0_i32_0 = arith.constant 0 : i32
    %c0_i32_1 = arith.constant 0 : i32
    return %c0_i32, %c0_i32_0 : i32, i32
  }
  func.func @transform_6(%arg0: i32) -> (i32, i32) {
    %c0_i32 = arith.constant 0 : i32
    %c0_i32_0 = arith.constant 0 : i32
    %c0_i32_1 = arith.constant 0 : i32
    return %c0_i32, %c0_i32_0 : i32, i32
  }
  func.func @transform_7(%arg0: i32) -> (i32, i32) {
    %c0_i32 = arith.constant 0 : i32
    %c0_i32_0 = arith.constant 0 : i32
    %c0_i32_1 = arith.constant 0 : i32
    return %c0_i32, %c0_i32_0 : i32, i32
  }
  func.func @transform_8(%arg0: i32) -> (i32, i32) {
    %c0_i32 = arith.constant 0 : i32
    %c0_i32_0 = arith.constant 0 : i32
    %c0_i32_1 = arith.constant 0 : i32
    return %c0_i32, %c0_i32_0 : i32, i32
  }
  func.func @transform_9(%arg0: i32) -> (i32, i32) {
    %c0_i32 = arith.constant 0 : i32
    %c0_i32_0 = arith.constant 0 : i32
    return %arg0, %c0_i32 : i32, i32
  }
}

</mosaic_0001>

<bundles_post_ra>
// kernel: lstm_model_forward.1
= control target key start
LH: loop header
LB: loop body
LE: loop exit
PB: predicated region body
PF: predicated region fallthrough
CT: control target
= control target key end

     0   :  { %vm47_vm0 = vcmask 130048   ;;  %s2004_s0 = inlined_call_operand.vmem [shape: f32[1,64,16], index: 0, kind: input, shape index: {}]   ;;  %s2005_s1 = inlined_call_operand.vmem [shape: f32[16,128], index: 1, kind: input, shape index: {}]   ;;  %s2006_s2 = inlined_call_operand.vmem [shape: f32[32,128], index: 2, kind: input, shape index: {}]   ;;  %s2007_s3 = inlined_call_operand.vmem [shape: f32[1,128], index: 3, kind: input, shape index: {}]   ;;  %s2008_s4 = inlined_call_operand.vmem [shape: f32[32,128], index: 4, kind: input, shape index: {}]   ;;  %s2009_s5 = inlined_call_operand.vmem [shape: f32[32,128], index: 5, kind: input, shape index: {}]   ;;  %s2010_s6 = inlined_call_operand.vmem [shape: f32[1,128], index: 6, kind: input, shape index: {}]   ;;  %s2011_s7 = inlined_call_operand.vmem [shape: f32[32,8], index: 7, kind: input, shape index: {}]   ;;  %s2012_s8 = inlined_call_operand.vmem [shape: f32[1,8], index: 8, kind: input, shape index: {}]   ;;  %s2013_s9 = inlined_call_operand.hbm [shape: f32[8,8], index: 9, kind: output, shape index: {}]  }
   0x1   :  { %v1644_v0 = vld [vmem:[%s2006_s2 + $0x18] sm:$0xff]  ;;  %v42_v1 = vld [vmem:[%s2005_s1 + $0x8] sm:$0xff]  ;;  %v1652_v2 = vld [vmem:[%s2006_s2 + $0x10] sm:$0xff] }
   0x2   :  { %147 = vmatpush.msra.mxu1 %v1644_v0  ;;  %86 = vmatpush.msra.mxu0 %v42_v1  ;;  %v41_v3 = vld [vmem:[%s2005_s1] sm:$0xff]  ;;  %v1664_v5 = vld [vmem:[%s2006_s2 + $0x8] sm:$0xff] }
   0x3   :  { %v33_v4 = vld [vmem:[%s2004_s0] sm:$0xff]  ;;  %235 = vmatpush.msra.mxu3 %v1644_v0 }
   0x4   :  { %148 = vmatpush.msra.mxu1 %v1652_v2  ;;  %87 = vmatpush.msra.mxu0 %v41_v3 }
   0x5   :  { %14 = vsyncpa [#allocation4], 0  ;;  %1379 = vmatmul.msk.f32.vlgmr.msra.gmra.mxu0 %vm47_vm0, %v33_v4  ;;  %v1672_v6 = vld [vmem:[%s2006_s2] sm:$0xff]  ;;  %236 = vmatpush.msra.mxu3 %v1652_v2  ;;  %v1587_v7 = vmov 0.0   ;;  %s1588_s2 = smov 64   ;;  %v1695_v33 = vld [vmem:[%s2008_s4 + $0x18] sm:$0xff] }
   0x6   :  { %149 = vmatpush.msra.mxu1 %v1664_v5  ;;  %v1683_v8 = vld [vmem:[%s2007_s3] ss:$0 sm:$0xff]  ;;  %s1589_s3 = smov 32   ;;  %v1700_v34 = vld [vmem:[%s2008_s4 + $0x10] sm:$0xff]  ;;  %213 = vmatpush.msra.mxu2 %v1695_v33  ;;  %v1707_v35 = vld [vmem:[%s2008_s4 + $0x8] sm:$0xff]  ;;  %vm131_vm5 = vcmask 261120  }
   0x7   :  { %237 = vmatpush.msra.mxu3 %v1664_v5  ;;  %v1715_v36 = vld [vmem:[%s2008_s4] sm:$0xff]  ;;  %v34_v39 = vld [vmem:[%s2004_s0 + $0x8] sm:$0xff]  ;;  %s1590_s17 = smov [#allocation3]   ;;  %s1370_s21 = sshll.u32 %s2013_s9, 4  ;;  %s1371_s21 = int_to_ptr.hbm [resolvable:$true] %s1370_s21 }
   0x8   :  { %150 = vmatpush.msra.mxu1 %v1672_v6  ;;  %214 = vmatpush.msra.mxu2 %v1700_v34  ;;  %s1368_s18 = sshll.u32 %s1590_s17, 4  ;;  %s1369_s18 = int_to_ptr.vmem [resolvable:$true] %s1368_s18 }
   0x9   :  { %151 = vmatmul.f32.vlgmr.msra.gmra.mxu1 %v1587_v7  ;;  %238 = vmatpush.msra.mxu3 %v1672_v6 }
   0xa   :  { %298 = vmatpush.msrb.mxu1 %v1695_v33  ;;  %215 = vmatpush.msra.mxu2 %v1707_v35 }
   0xb   :  { %383 = vmatpush.msrb.mxu3 %v1695_v33 }
   0xc   :  { %299 = vmatpush.msrb.mxu1 %v1700_v34  ;;  %216 = vmatpush.msra.mxu2 %v1715_v36 }
   0xd   :  { %384 = vmatpush.msrb.mxu3 %v1700_v34  ;;  %1380 = vmatmul.msk.f32.gmra.mxu0 %vm47_vm0, %v34_v39 }
   0xe   :  { %300 = vmatpush.msrb.mxu1 %v1707_v35  ;;  %320 = vmatpush.msrb.mxu2 %v1644_v0 }
   0xf   :  { %385 = vmatpush.msrb.mxu3 %v1707_v35 }
  0x10   :  { %301 = vmatpush.msrb.mxu1 %v1715_v36  ;;  %321 = vmatpush.msrb.mxu2 %v1652_v2 }
  0x11   :  { %386 = vmatpush.msrb.mxu3 %v1715_v36 }
  0x12   :  { %405 = vmatpush.msra.mxu1 %v1644_v0  ;;  %322 = vmatpush.msrb.mxu2 %v1664_v5 }
  0x14   :  { %406 = vmatpush.msra.mxu1 %v1652_v2  ;;  %323 = vmatpush.msrb.mxu2 %v1672_v6 }
  0x16   :  { %407 = vmatpush.msra.mxu1 %v1664_v5 }
  0x18   :  { %408 = vmatpush.msra.mxu1 %v1672_v6 }
  0x82   :  { %v89_v9 = vpop.f32.mrf.mxu0 }
  0x83   :  { %v90_v10 = vadd.f32 %v1683_v8, %v89_v9  ;;  %v35_v9 = vld [vmem:[%s2004_s0 + $0x10] sm:$0xff] }
  0x84   :  { %1381 = vmatmul.msk.f32.gmra.mxu0 %vm47_vm0, %v35_v9 }
  0x86   :  { %v152_v11 = vpop.f32.mrf.mxu1 }
  0x87   :  { %v155_v12 = vadd.f32 %v152_v11, %v90_v10 }
  0x89   :  { %1433 = vtanh.f32 %v155_v12  ;;  %v1387_v14 = vmul.f32 -1.442695, %v155_v12 }
  0x8a   :  { %v92_v41 = vpop.f32.mrf.mxu0 }
  0x8b   :  { %1435 = vpow2.f32 %v1387_v14  ;;  %v93_v42 = vadd.f32 %v1683_v8, %v92_v41 }
  0x8f   :  { %v1434_v13 = vpop.eup %1433 }
  0x90   :  { %178 = vrot.lane.b32.xlu0 %v1434_v13, %s1588_s2 }
  0x91   :  { %v1436_v15 = vpop.eup %1435 }
  0x92   :  { %v159_v16 = vadd.f32 1.0, %v1436_v15 }
  0x94   :  { %1437 = vrcp.f32 %v159_v16  ;;  %v171_v22 = vand.u32 2147483648, %v159_v16  ;;  %vm165_vm2 = vweird.f32 %v159_v16  ;;  %v169_v23 = vand.u32 2147483647, %v159_v16 }
  0x96   :  { %v172_v25 = vor.u32 1.1754944e-38, %v171_v22  ;;  %vm170_vm4 = vcmp.eq.f32.partialorder %v169_v23, 8.507059e+37 }
  0x9a   :  { %v1438_v17 = vpop.eup %1437 }
  0x9b   :  { %v161_v18 = vmul.f32 %v1438_v17, %v159_v16  ;;  %vm166_vm1 = vweird.f32 %v1438_v17 }
  0x9c   :  { %vm167_vm3 = vmor %vm165_vm2, %vm166_vm1 }
  0x9d   :  { %v162_v19 = vsub.f32 1.0, %v161_v18 }
  0x9f   :  { %v163_v20 = vmul.f32 %v1438_v17, %v162_v19 }
  0xa1   :  { %v164_v21 = vadd.f32 %v1438_v17, %v163_v20 }
  0xa3   :  { %v168_v24 = vsel %vm167_vm3, %v1438_v17, %v164_v21 }
  0xa4   :  { %v173_v27 = vsel %vm170_vm4, %v172_v25, %v168_v24 }
  0xa5   :  { %v176_v29 = vmul.f32 0.0, %v173_v27 }
 0x101   :  { %v95_v12 = vpop.f32.mrf.mxu0 }
 0x102   :  { %v179_v26 = vpop.permute.xlu0 %178  ;;  %v96_v13 = vadd.f32 %v1683_v8, %v95_v12 }
 0x103   :  { %v181_v28 = vmul.f32 %v179_v26, %v173_v27 }
 0x105   :  { %183 = vrot.lane.b32.xlu0 %v181_v28, %s1589_s3 }
 0x177   :  { %v184_v30 = vpop.permute.xlu0 %183 }
 0x178   :  { %v1688_v31 = vadd.f32 %v184_v30, %v176_v29 }
 0x17a   :  { %1439 = vtanh.f32 %v1688_v31 }
 0x180   :  { %v1440_v32 = vpop.eup %1439 }
 0x181   :  { %189 = vrot.lane.b32.xlu1 %v1440_v32, %s1588_s2 }
 0x1f3   :  { %v190_v37 = vpop.permute.xlu1 %189 }
 0x1f4   :  { %v192_v38 = vmul.f32 %v190_v37, %v173_v27 }
 0x1f6   :  { %197 = vrot.lane.b32.xlu1 %v192_v38, %s1589_s3 }
 0x268   :  { %v198_v40 = vpop.permute.xlu1 %197 }
 0x269   :  { %1388 = vmatmul.msk.f32.vlgmr.msra.gmra.mxu2 %vm131_vm5, %v198_v40  ;;  %1389 = vmatmul.msk.f32.vlgmr.msra.gmra.mxu3 %vm131_vm5, %v198_v40  ;;  %v36_v40 = vld [vmem:[%s2004_s0 + $0x18] sm:$0xff] }
 0x26a   :  { %490 = vmatpush.msra.mxu3 %v1644_v0  ;;  %468 = vmatpush.msra.mxu2 %v1695_v33 }
 0x26b   :  { %1382 = vmatmul.msk.f32.gmra.mxu0 %vm47_vm0, %v36_v40 }
 0x26c   :  { %491 = vmatpush.msra.mxu3 %v1652_v2  ;;  %469 = vmatpush.msra.mxu2 %v1700_v34 }
 0x26e   :  { %492 = vmatpush.msra.mxu3 %v1664_v5  ;;  %470 = vmatpush.msra.mxu2 %v1707_v35 }
 0x270   :  { %493 = vmatpush.msra.mxu3 %v1672_v6  ;;  %471 = vmatpush.msra.mxu2 %v1715_v36 }
 0x2ec   :  { %v240_v43 = vpop.f32.mrf.mxu3  ;;  %v1767_v11 = vpop.f32.mrf.mxu2 }
 0x2ed   :  { %v243_v44 = vadd.f32 %v240_v43, %v93_v42 }
 0x2ef   :  { %1441 = vtanh.f32 %v243_v44  ;;  %v1390_v46 = vmul.f32 -1.442695, %v243_v44 }
 0x2f1   :  { %1443 = vpow2.f32 %v1390_v46 }
 0x2f5   :  { %v1442_v45 = vpop.eup %1441 }
 0x2f6   :  { %266 = vrot.lane.b32.xlu2 %v1442_v45, %s1588_s2  ;;  %v98_v45 = vpop.f32.mrf.mxu0 }
 0x2f7   :  { %v1444_v47 = vpop.eup %1443  ;;  %v99_v46 = vadd.f32 %v1683_v8, %v98_v45 }
 0x2f8   :  { %v247_v48 = vadd.f32 1.0, %v1444_v47 }
 0x2fa   :  { %1445 = vrcp.f32 %v247_v48  ;;  %v259_v54 = vand.u32 2147483648, %v247_v48  ;;  %vm253_vm7 = vweird.f32 %v247_v48  ;;  %v257_v55 = vand.u32 2147483647, %v247_v48 }
 0x2fc   :  { %v260_v57 = vor.u32 1.1754944e-38, %v259_v54  ;;  %vm258_vm9 = vcmp.eq.f32.partialorder %v257_v55, 8.507059e+37 }
 0x300   :  { %v1446_v49 = vpop.eup %1445 }
 0x301   :  { %v249_v50 = vmul.f32 %v1446_v49, %v247_v48  ;;  %vm254_vm6 = vweird.f32 %v1446_v49 }
 0x302   :  { %vm255_vm8 = vmor %vm253_vm7, %vm254_vm6 }
 0x303   :  { %v250_v51 = vsub.f32 1.0, %v249_v50 }
 0x305   :  { %v251_v52 = vmul.f32 %v1446_v49, %v250_v51 }
 0x307   :  { %v252_v53 = vadd.f32 %v1446_v49, %v251_v52 }
 0x309   :  { %v256_v56 = vsel %vm255_vm8, %v1446_v49, %v252_v53 }
 0x30a   :  { %v261_v59 = vsel %vm258_vm9, %v260_v57, %v256_v56 }
 0x30b   :  { %v264_v61 = vmul.f32 %v261_v59, %v1688_v31 }
 0x350   :  { %v267_v58 = vpop.permute.xlu2 %266 }
 0x351   :  { %v269_v60 = vmul.f32 %v267_v58, %v261_v59 }
 0x353   :  { %271 = vrot.lane.b32.xlu2 %v269_v60, %s1589_s3 }
 0x3ad   :  { %v272_v62 = vpop.permute.xlu2 %271 }
 0x3ae   :  { %v274_v63 = vadd.f32 %v272_v62, %v264_v61 }
 0x3b0   :  { %1447 = vtanh.f32 %v274_v63 }
 0x3b6   :  { %v1448_v1 = vpop.eup %1447 }
 0x3b7   :  { %277 = vrot.lane.b32.xlu0 %v1448_v1, %s1588_s2 }
 0x429   :  { %v278_v3 = vpop.permute.xlu0 %277 }
 0x42a   :  { %v280_v4 = vmul.f32 %v278_v3, %v261_v59 }
 0x42c   :  { %282 = vrot.lane.b32.xlu1 %v280_v4, %s1589_s3 }
 0x49e   :  { %v283_v10 = vpop.permute.xlu1 %282 }
 0x49f   :  { %1391 = vmatmul.msk.f32.vlgmr.msrb.gmra.mxu1 %vm131_vm5, %v283_v10  ;;  %1392 = vmatmul.msk.f32.vlgmr.msrb.gmra.mxu2 %vm131_vm5, %v283_v10 }
 0x4a0   :  { %575 = vmatpush.msrb.mxu2 %v1644_v0  ;;  %553 = vmatpush.msrb.mxu1 %v1695_v33 }
 0x4a2   :  { %576 = vmatpush.msrb.mxu2 %v1652_v2  ;;  %554 = vmatpush.msrb.mxu1 %v1700_v34 }
 0x4a4   :  { %577 = vmatpush.msrb.mxu2 %v1664_v5  ;;  %555 = vmatpush.msrb.mxu1 %v1707_v35 }
 0x4a6   :  { %578 = vmatpush.msrb.mxu2 %v1672_v6  ;;  %556 = vmatpush.msrb.mxu1 %v1715_v36 }
 0x51c   :  { %v1788_v44 = vpop.f32.mrf.mxu1 }
 0x522   :  { %v325_v14 = vpop.f32.mrf.mxu2 }
 0x523   :  { %v328_v15 = vadd.f32 %v325_v14, %v96_v13  ;;  %v37_v14 = vld [vmem:[%s2004_s0 + $0x20] sm:$0xff] }
 0x524   :  { %1383 = vmatmul.msk.f32.gmra.mxu0 %vm47_vm0, %v37_v14 }
 0x525   :  { %1449 = vtanh.f32 %v328_v15  ;;  %v1393_v17 = vmul.f32 -1.442695, %v328_v15 }
 0x527   :  { %1451 = vpow2.f32 %v1393_v17 }
 0x52b   :  { %v1450_v16 = vpop.eup %1449 }
 0x52c   :  { %351 = vrot.lane.b32.xlu2 %v1450_v16, %s1588_s2 }
 0x52d   :  { %v1452_v18 = vpop.eup %1451 }
 0x52e   :  { %v332_v19 = vadd.f32 1.0, %v1452_v18 }
 0x530   :  { %1453 = vrcp.f32 %v332_v19  ;;  %v344_v25 = vand.u32 2147483648, %v332_v19  ;;  %vm338_vm11 = vweird.f32 %v332_v19  ;;  %v342_v26 = vand.u32 2147483647, %v332_v19 }
 0x532   :  { %v345_v28 = vor.u32 1.1754944e-38, %v344_v25  ;;  %vm343_vm13 = vcmp.eq.f32.partialorder %v342_v26, 8.507059e+37 }
 0x536   :  { %v1454_v20 = vpop.eup %1453 }
 0x537   :  { %v334_v21 = vmul.f32 %v1454_v20, %v332_v19  ;;  %vm339_vm10 = vweird.f32 %v1454_v20 }
 0x538   :  { %vm340_vm12 = vmor %vm338_vm11, %vm339_vm10 }
 0x539   :  { %v335_v22 = vsub.f32 1.0, %v334_v21 }
 0x53b   :  { %v336_v23 = vmul.f32 %v1454_v20, %v335_v22 }
 0x53d   :  { %v337_v24 = vadd.f32 %v1454_v20, %v336_v23 }
 0x53f   :  { %v341_v27 = vsel %vm340_vm12, %v1454_v20, %v337_v24 }
 0x540   :  { %v346_v30 = vsel %vm343_vm13, %v345_v28, %v341_v27 }
 0x541   :  { %v349_v32 = vmul.f32 %v346_v30, %v274_v63 }
 0x586   :  { %v352_v29 = vpop.permute.xlu2 %351 }
 0x587   :  { %v354_v31 = vmul.f32 %v352_v29, %v346_v30 }
 0x589   :  { %356 = vrot.lane.b32.xlu0 %v354_v31, %s1589_s3 }
 0x5a1   :  { %v101_v17 = vpop.f32.mrf.mxu0 }
 0x5a2   :  { %v102_v18 = vadd.f32 %v1683_v8, %v101_v17 }
 0x5fb   :  { %v357_v37 = vpop.permute.xlu0 %356 }
 0x5fc   :  { %v359_v38 = vadd.f32 %v357_v37, %v349_v32 }
 0x5fe   :  { %1455 = vtanh.f32 %v359_v38 }
 0x604   :  { %v1456_v39 = vpop.eup %1455 }
 0x605   :  { %362 = vrot.lane.b32.xlu1 %v1456_v39, %s1588_s2 }
 0x677   :  { %v363_v41 = vpop.permute.xlu1 %362 }
 0x678   :  { %v365_v42 = vmul.f32 %v363_v41, %v346_v30 }
 0x67a   :  { %367 = vrot.lane.b32.xlu2 %v365_v42, %s1589_s3 }
 0x6d4   :  { %v368_v43 = vpop.permute.xlu2 %367 }
 0x6d5   :  { %1394 = vmatmul.msk.f32.vlgmr.msrb.gmra.mxu3 %vm131_vm5, %v368_v43  ;;  %1395 = vmatmul.msk.f32.vlgmr.msra.gmra.mxu1 %vm131_vm5, %v368_v43  ;;  %v38_v43 = vld [vmem:[%s2004_s0 + $0x28] sm:$0xff] }
 0x6d6   :  { %660 = vmatpush.msra.mxu1 %v1644_v0  ;;  %638 = vmatpush.msrb.mxu3 %v1695_v33 }
 0x6d7   :  { %1384 = vmatmul.msk.f32.gmra.mxu0 %vm47_vm0, %v38_v43  ;;  %v1857_v43 = vld [vmem:[%s2009_s5 + $0x10] sm:$0xff] }
 0x6d8   :  { %661 = vmatpush.msra.mxu1 %v1652_v2  ;;  %639 = vmatpush.msrb.mxu3 %v1700_v34 }
 0x6da   :  { %662 = vmatpush.msra.mxu1 %v1664_v5  ;;  %640 = vmatpush.msrb.mxu3 %v1707_v35 }
 0x6dc   :  { %663 = vmatpush.msra.mxu1 %v1672_v6  ;;  %641 = vmatpush.msrb.mxu3 %v1715_v36 }
 0x752   :  { %v410_v47 = vpop.f32.mrf.mxu1 }
 0x753   :  { %v413_v48 = vadd.f32 %v410_v47, %v99_v46 }
 0x754   :  { %v104_v47 = vpop.f32.mrf.mxu0 }
 0x755   :  { %1457 = vtanh.f32 %v413_v48  ;;  %v1396_v50 = vmul.f32 -1.442695, %v413_v48  ;;  %v105_v48 = vadd.f32 %v1683_v8, %v104_v47  ;;  %v1867_v47 = vld [vmem:[%s2009_s5 + $0x8] sm:$0xff] }
 0x757   :  { %1459 = vpow2.f32 %v1396_v50 }
 0x758   :  { %v1809_v16 = vpop.f32.mrf.mxu3 }
 0x75b   :  { %v1458_v49 = vpop.eup %1457 }
 0x75c   :  { %436 = vrot.lane.b32.xlu0 %v1458_v49, %s1588_s2 }
 0x75d   :  { %v1460_v51 = vpop.eup %1459 }
 0x75e   :  { %v417_v52 = vadd.f32 1.0, %v1460_v51 }
 0x760   :  { %1461 = vrcp.f32 %v417_v52  ;;  %v429_v58 = vand.u32 2147483648, %v417_v52  ;;  %vm423_vm15 = vweird.f32 %v417_v52  ;;  %v427_v59 = vand.u32 2147483647, %v417_v52 }
 0x762   :  { %v430_v61 = vor.u32 1.1754944e-38, %v429_v58  ;;  %vm428_vm2 = vcmp.eq.f32.partialorder %v427_v59, 8.507059e+37 }
 0x766   :  { %v1462_v53 = vpop.eup %1461 }
 0x767   :  { %v419_v54 = vmul.f32 %v1462_v53, %v417_v52  ;;  %vm424_vm14 = vweird.f32 %v1462_v53 }
 0x768   :  { %vm425_vm1 = vmor %vm423_vm15, %vm424_vm14 }
 0x769   :  { %v420_v55 = vsub.f32 1.0, %v419_v54 }
 0x76b   :  { %v421_v56 = vmul.f32 %v1462_v53, %v420_v55 }
 0x76d   :  { %v422_v57 = vadd.f32 %v1462_v53, %v421_v56 }
 0x76f   :  { %v426_v60 = vsel %vm425_vm1, %v1462_v53, %v422_v57 }
 0x770   :  { %v431_v63 = vsel %vm428_vm2, %v430_v61, %v426_v60 }
 0x771   :  { %v434_v3 = vmul.f32 %v431_v63, %v359_v38 }
 0x7ce   :  { %v437_v62 = vpop.permute.xlu0 %436 }
 0x7cf   :  { %v439_v1 = vmul.f32 %v437_v62, %v431_v63 }
 0x7d1   :  { %441 = vrot.lane.b32.xlu1 %v439_v1, %s1589_s3 }
 0x843   :  { %v442_v4 = vpop.permute.xlu1 %441 }
 0x844   :  { %v444_v9 = vadd.f32 %v442_v4, %v434_v3 }
 0x846   :  { %1463 = vtanh.f32 %v444_v9 }
 0x84c   :  { %v1464_v10 = vpop.eup %1463 }
 0x84d   :  { %447 = vrot.lane.b32.xlu2 %v1464_v10, %s1588_s2 }
 0x8a7   :  { %v448_v12 = vpop.permute.xlu2 %447 }
 0x8a8   :  { %v450_v13 = vmul.f32 %v448_v12, %v431_v63 }
 0x8aa   :  { %452 = vrot.lane.b32.xlu0 %v450_v13, %s1589_s3 }
 0x91c   :  { %v453_v15 = vpop.permute.xlu0 %452 }
 0x91d   :  { %1397 = vmatmul.msk.f32.vlgmr.msra.gmra.mxu2 %vm131_vm5, %v453_v15  ;;  %1398 = vmatmul.msk.f32.vlgmr.msra.gmra.mxu3 %vm131_vm5, %v453_v15 }
 0x91e   :  { %723 = vmatpush.msra.mxu2 %v1695_v33  ;;  %745 = vmatpush.msra.mxu3 %v1644_v0 }
 0x920   :  { %724 = vmatpush.msra.mxu2 %v1700_v34  ;;  %746 = vmatpush.msra.mxu3 %v1652_v2 }
 0x922   :  { %725 = vmatpush.msra.mxu2 %v1707_v35  ;;  %747 = vmatpush.msra.mxu3 %v1664_v5 }
 0x924   :  { %726 = vmatpush.msra.mxu2 %v1715_v36  ;;  %748 = vmatpush.msra.mxu3 %v1672_v6 }
 0x9a0   :  { %v495_v19 = vpop.f32.mrf.mxu3  ;;  %v1826_v46 = vpop.f32.mrf.mxu2 }
 0x9a1   :  { %v498_v20 = vadd.f32 %v495_v19, %v102_v18 }
 0x9a3   :  { %1465 = vtanh.f32 %v498_v20  ;;  %v1399_v2 = vmul.f32 -1.442695, %v498_v20 }
 0x9a5   :  { %1467 = vpow2.f32 %v1399_v2 }
 0x9a9   :  { %v1466_v0 = vpop.eup %1465 }
 0x9aa   :  { %521 = vrot.lane.b32.xlu1 %v1466_v0, %s1588_s2 }
 0x9ab   :  { %v1468_v21 = vpop.eup %1467 }
 0x9ac   :  { %v502_v22 = vadd.f32 1.0, %v1468_v21 }
 0x9ae   :  { %1469 = vrcp.f32 %v502_v22  ;;  %v514_v26 = vand.u32 2147483648, %v502_v22  ;;  %vm508_vm4 = vweird.f32 %v502_v22  ;;  %v512_v27 = vand.u32 2147483647, %v502_v22 }
 0x9b0   :  { %v515_v29 = vor.u32 1.1754944e-38, %v514_v26  ;;  %vm513_vm7 = vcmp.eq.f32.partialorder %v512_v27, 8.507059e+37 }
 0x9b4   :  { %v1470_v5 = vpop.eup %1469 }
 0x9b5   :  { %v504_v23 = vmul.f32 %v1470_v5, %v502_v22  ;;  %vm509_vm3 = vweird.f32 %v1470_v5 }
 0x9b6   :  { %vm510_vm6 = vmor %vm508_vm4, %vm509_vm3 }
 0x9b7   :  { %v505_v24 = vsub.f32 1.0, %v504_v23 }
 0x9b9   :  { %v506_v6 = vmul.f32 %v1470_v5, %v505_v24 }
 0x9bb   :  { %v507_v25 = vadd.f32 %v1470_v5, %v506_v6 }
 0x9bd   :  { %v511_v28 = vsel %vm510_vm6, %v1470_v5, %v507_v25 }
 0x9be   :  { %v516_v31 = vsel %vm513_vm7, %v515_v29, %v511_v28 }
 0x9bf   :  { %v519_v37 = vmul.f32 %v516_v31, %v444_v9  ;;  %v39_v9 = vld [vmem:[%s2004_s0 + $0x30] sm:$0xff] }
 0x9c0   :  { %1385 = vmatmul.msk.f32.gmra.mxu0 %vm47_vm0, %v39_v9 }
 0xa1c   :  { %v522_v30 = vpop.permute.xlu1 %521 }
 0xa1d   :  { %v524_v32 = vmul.f32 %v522_v30, %v516_v31 }
 0xa1f   :  { %526 = vrot.lane.b32.xlu2 %v524_v32, %s1589_s3 }
 0xa3d   :  { %v107_v15 = vpop.f32.mrf.mxu0 }
 0xa3e   :  { %v108_v17 = vadd.f32 %v1683_v8, %v107_v15 }
 0xa79   :  { %v527_v38 = vpop.permute.xlu2 %526 }
 0xa7a   :  { %v529_v39 = vadd.f32 %v527_v38, %v519_v37 }
 0xa7c   :  { %1471 = vtanh.f32 %v529_v39 }
 0xa82   :  { %v1472_v40 = vpop.eup %1471 }
 0xa83   :  { %532 = vrot.lane.b32.xlu0 %v1472_v40, %s1588_s2 }
 0xaf5   :  { %v533_v41 = vpop.permute.xlu0 %532 }
 0xaf6   :  { %v535_v42 = vmul.f32 %v533_v41, %v516_v31 }
 0xaf8   :  { %537 = vrot.lane.b32.xlu1 %v535_v42, %s1589_s3  ;;  %v1852_v42 = vld [vmem:[%s2009_s5 + $0x18] sm:$0xff] }
 0xb6a   :  { %v538_v45 = vpop.permute.xlu1 %537 }
 0xb6b   :  { %1400 = vmatmul.msk.f32.vlgmr.msrb.gmra.mxu1 %vm131_vm5, %v538_v45  ;;  %1401 = vmatmul.msk.f32.vlgmr.msrb.gmra.mxu2 %vm131_vm5, %v538_v45  ;;  %v40_v45 = vld [vmem:[%s2004_s0 + $0x38] sm:$0xff] }
 0xb6c   :  { %808 = vmatpush.msrb.mxu1 %v1695_v33  ;;  %834 = vmatpush.msrb.mxu2 %v1852_v42 }
 0xb6d   :  { %1386 = vmatmul.msk.f32.gmra.mxu0 %vm47_vm0, %v40_v45 }
 0xb6e   :  { %809 = vmatpush.msrb.mxu1 %v1700_v34  ;;  %835 = vmatpush.msrb.mxu2 %v1857_v43 }
 0xb70   :  { %810 = vmatpush.msrb.mxu1 %v1707_v35  ;;  %836 = vmatpush.msrb.mxu2 %v1867_v47 }
 0xb72   :  { %811 = vmatpush.msrb.mxu1 %v1715_v36 }
 0xbe8   :  { %v1839_v14 = vpop.f32.mrf.mxu1 }
 0xbee   :  { %v580_v49 = vpop.f32.mrf.mxu2 }
 0xbef   :  { %v583_v50 = vadd.f32 %v580_v49, %v105_v48  ;;  %v1875_v48 = vld [vmem:[%s2009_s5] sm:$0xff] }
 0xbf0   :  { %837 = vmatpush.msrb.mxu2 %v1875_v48 }
 0xbf1   :  { %1473 = vtanh.f32 %v583_v50  ;;  %v1402_v52 = vmul.f32 -1.442695, %v583_v50 }
 0xbf3   :  { %1475 = vpow2.f32 %v1402_v52 }
 0xbf7   :  { %v1474_v51 = vpop.eup %1473 }
 0xbf8   :  { %606 = vrot.lane.b32.xlu2 %v1474_v51, %s1588_s2  ;;  %v1905_v51 = vld [vmem:[%s2010_s6] ss:$0 sm:$0xff] }
 0xbf9   :  { %v1476_v33 = vpop.eup %1475  ;;  %v219_v52 = vadd.f32 %v1905_v51, %v1767_v11 }
 0xbfa   :  { %v587_v53 = vadd.f32 1.0, %v1476_v33 }
 0xbfc   :  { %1477 = vrcp.f32 %v587_v53  ;;  %v599_v56 = vand.u32 2147483648, %v587_v53  ;;  %vm593_vm9 = vweird.f32 %v587_v53  ;;  %v597_v57 = vand.u32 2147483647, %v587_v53 }
 0xbfe   :  { %v600_v59 = vor.u32 1.1754944e-38, %v599_v56  ;;  %vm598_vm11 = vcmp.eq.f32.partialorder %v597_v57, 8.507059e+37 }
 0xc02   :  { %v1478_v34 = vpop.eup %1477 }
 0xc03   :  { %v589_v35 = vmul.f32 %v1478_v34, %v587_v53  ;;  %vm594_vm8 = vweird.f32 %v1478_v34 }
 0xc04   :  { %vm595_vm10 = vmor %vm593_vm9, %vm594_vm8 }
 0xc05   :  { %v590_v54 = vsub.f32 1.0, %v589_v35 }
 0xc07   :  { %v591_v36 = vmul.f32 %v1478_v34, %v590_v54 }
 0xc09   :  { %v592_v55 = vadd.f32 %v1478_v34, %v591_v36 }
 0xc0b   :  { %v596_v58 = vsel %vm595_vm10, %v1478_v34, %v592_v55 }
 0xc0c   :  { %v601_v61 = vsel %vm598_vm11, %v600_v59, %v596_v58  ;;  %v110_v59 = vpop.f32.mrf.mxu0 }
 0xc0d   :  { %v604_v63 = vmul.f32 %v601_v61, %v529_v39 }
 0xc52   :  { %v607_v60 = vpop.permute.xlu2 %606 }
 0xc53   :  { %v609_v62 = vmul.f32 %v607_v60, %v601_v61 }
 0xc55   :  { %611 = vrot.lane.b32.xlu0 %v609_v62, %s1589_s3  ;;  %v111_v62 = vadd.f32 %v1683_v8, %v110_v59 }
 0xcc7   :  { %v612_v1 = vpop.permute.xlu0 %611 }
 0xcc8   :  { %v614_v3 = vadd.f32 %v612_v1, %v604_v63 }
 0xcca   :  { %1479 = vtanh.f32 %v614_v3 }
 0xcd0   :  { %v1480_v4 = vpop.eup %1479 }
 0xcd1   :  { %617 = vrot.lane.b32.xlu1 %v1480_v4, %s1588_s2 }
 0xd43   :  { %v618_v10 = vpop.permute.xlu1 %617 }
 0xd44   :  { %v620_v12 = vmul.f32 %v618_v10, %v601_v61 }
 0xd46   :  { %622 = vrot.lane.b32.xlu2 %v620_v12, %s1589_s3 }
 0xda0   :  { %v623_v13 = vpop.permute.xlu2 %622 }
 0xda1   :  { %1403 = vmatmul.msk.f32.vlgmr.msrb.gmra.mxu3 %vm131_vm5, %v623_v13  ;;  %1404 = vmatmul.msk.f32.vlgmr.msra.gmra.mxu1 %vm131_vm5, %v623_v13 }
 0xda2   :  { %898 = vmatpush.msrb.mxu3 %v1852_v42  ;;  %962 = vmatpush.msra.mxu1 %v1852_v42 }
 0xda4   :  { %899 = vmatpush.msrb.mxu3 %v1857_v43  ;;  %963 = vmatpush.msra.mxu1 %v1857_v43 }
 0xda6   :  { %900 = vmatpush.msrb.mxu3 %v1867_v47  ;;  %964 = vmatpush.msra.mxu1 %v1867_v47 }
 0xda8   :  { %901 = vmatpush.msrb.mxu3 %v1875_v48  ;;  %965 = vmatpush.msra.mxu1 %v1875_v48 }
 0xe1e   :  { %v665_v18 = vpop.f32.mrf.mxu1 }
 0xe1f   :  { %v668_v19 = vadd.f32 %v665_v18, %v108_v17 }
 0xe21   :  { %1481 = vtanh.f32 %v668_v19  ;;  %v1405_v0 = vmul.f32 -1.442695, %v668_v19 }
 0xe23   :  { %1483 = vpow2.f32 %v1405_v0 }
 0xe24   :  { %v1910_v57 = vpop.f32.mrf.mxu3 }
 0xe27   :  { %v1482_v20 = vpop.eup %1481 }
 0xe28   :  { %691 = vrot.lane.b32.xlu0 %v1482_v20, %s1588_s2 }
 0xe29   :  { %v1484_v2 = vpop.eup %1483 }
 0xe2a   :  { %v672_v21 = vadd.f32 1.0, %v1484_v2 }
 0xe2c   :  { %1485 = vrcp.f32 %v672_v21  ;;  %v684_v25 = vand.u32 2147483648, %v672_v21  ;;  %vm678_vm13 = vweird.f32 %v672_v21  ;;  %v682_v26 = vand.u32 2147483647, %v672_v21 }
 0xe2e   :  { %v685_v28 = vor.u32 1.1754944e-38, %v684_v25  ;;  %vm683_vm15 = vcmp.eq.f32.partialorder %v682_v26, 8.507059e+37 }
 0xe32   :  { %v1486_v22 = vpop.eup %1485 }
 0xe33   :  { %v674_v5 = vmul.f32 %v1486_v22, %v672_v21  ;;  %vm679_vm12 = vweird.f32 %v1486_v22 }
 0xe34   :  { %vm680_vm14 = vmor %vm678_vm13, %vm679_vm12 }
 0xe35   :  { %v675_v23 = vsub.f32 1.0, %v674_v5 }
 0xe37   :  { %v676_v24 = vmul.f32 %v1486_v22, %v675_v23 }
 0xe39   :  { %v677_v6 = vadd.f32 %v1486_v22, %v676_v24 }
 0xe3b   :  { %v681_v27 = vsel %vm680_vm14, %v1486_v22, %v677_v6 }
 0xe3c   :  { %v686_v30 = vsel %vm683_vm15, %v685_v28, %v681_v27 }
 0xe3d   :  { %v689_v32 = vmul.f32 %v686_v30, %v614_v3 }
 0xe9a   :  { %v692_v29 = vpop.permute.xlu0 %691 }
 0xe9b   :  { %v694_v31 = vmul.f32 %v692_v29, %v686_v30 }
 0xe9d   :  { %696 = vrot.lane.b32.xlu1 %v694_v31, %s1589_s3 }
 0xf0f   :  { %v697_v37 = vpop.permute.xlu1 %696 }
 0xf10   :  { %v1844_v38 = vadd.f32 %v697_v37, %v689_v32  ;;  %v304_v37 = vadd.f32 %v1905_v51, %v1788_v44 }
 0xf12   :  { %1487 = vtanh.f32 %v1844_v38 }
 0xf18   :  { %v1488_v39 = vpop.eup %1487 }
 0xf19   :  { %702 = vrot.lane.b32.xlu2 %v1488_v39, %s1588_s2 }
 0xf73   :  { %v703_v40 = vpop.permute.xlu2 %702 }
 0xf74   :  { %v705_v41 = vmul.f32 %v703_v40, %v686_v30 }
 0xf76   :  { %707 = vrot.lane.b32.xlu0 %v705_v41, %s1589_s3 }
 0xfe8   :  { %v708_v49 = vpop.permute.xlu0 %707 }
 0xfe9   :  { %1406 = vmatmul.msk.f32.vlgmr.msra.gmra.mxu2 %vm131_vm5, %v708_v49  ;;  %1407 = vmatmul.msk.f32.vlgmr.msra.gmra.mxu3 %vm131_vm5, %v708_v49 }
 0xfea   :  { %1026 = vmatpush.msra.mxu2 %v1852_v42  ;;  %1090 = vmatpush.msra.mxu3 %v1852_v42 }
 0xfec   :  { %1027 = vmatpush.msra.mxu2 %v1857_v43  ;;  %1091 = vmatpush.msra.mxu3 %v1857_v43 }
 0xfee   :  { %1028 = vmatpush.msra.mxu2 %v1867_v47  ;;  %1092 = vmatpush.msra.mxu3 %v1867_v47 }
 0xff0   :  { %1029 = vmatpush.msra.mxu2 %v1875_v48  ;;  %1093 = vmatpush.msra.mxu3 %v1875_v48 }
 0xff1   :  { %838 = vmatmul.f32.vlgmr.msrb.gmra.mxu2 %v1587_v7 }
 0xff2   :  { %1218 = vmatpush.msrb.mxu2 %v1852_v42 }
 0xff4   :  { %1219 = vmatpush.msrb.mxu2 %v1857_v43 }
 0xff6   :  { %1220 = vmatpush.msrb.mxu2 %v1867_v47 }
 0xff8   :  { %1221 = vmatpush.msrb.mxu2 %v1875_v48 }
0x106c   :  { %v1900_v50 = vpop.f32.mrf.mxu2  ;;  %v750_v63 = vpop.f32.mrf.mxu3 }
0x106d   :  { %v753_v4 = vadd.f32 %v750_v63, %v111_v62 }
0x106f   :  { %v1408_v19 = vmul.f32 -1.442695, %v753_v4 }
0x1074   :  { %v839_v33 = vpop.f32.mrf.mxu2 }
0x1075   :  { %v842_v7 = vadd.f32 %v839_v33, %v219_v52 }
0x1077   :  { %1489 = vtanh.f32 %v842_v7  ;;  %v1410_v34 = vmul.f32 -1.442695, %v842_v7 }
0x1079   :  { %1491 = vpow2.f32 %v1410_v34 }
0x107d   :  { %v1490_v53 = vpop.eup %1489 }
0x107e   :  { %865 = vrot.lane.b32.xlu1 %v1490_v53, %s1588_s2 }
0x107f   :  { %v1492_v35 = vpop.eup %1491 }
0x1080   :  { %v846_v54 = vadd.f32 1.0, %v1492_v35 }
0x1082   :  { %1493 = vrcp.f32 %v846_v54  ;;  %v858_v11 = vand.u32 2147483648, %v846_v54  ;;  %vm852_vm1 = vweird.f32 %v846_v54  ;;  %v856_v61 = vand.u32 2147483647, %v846_v54 }
0x1083   :  { %1495 = vtanh.f32 %v753_v4 }
0x1084   :  { %v859_v3 = vor.u32 1.1754944e-38, %v858_v11  ;;  %vm857_vm3 = vcmp.eq.f32.partialorder %v856_v61, 8.507059e+37 }
0x1088   :  { %v1494_v36 = vpop.eup %1493 }
0x1089   :  { %v848_v55 = vmul.f32 %v1494_v36, %v846_v54  ;;  %vm853_vm0 = vweird.f32 %v1494_v36  ;;  %v1496_v13 = vpop.eup %1495 }
0x108a   :  { %vm854_vm2 = vmor %vm852_vm1, %vm853_vm0 }
0x108b   :  { %v849_v56 = vsub.f32 1.0, %v848_v55 }
0x108d   :  { %v850_v58 = vmul.f32 %v1494_v36, %v849_v56 }
0x108f   :  { %v851_v60 = vadd.f32 %v1494_v36, %v850_v58 }
0x1091   :  { %v855_v1 = vsel %vm854_vm2, %v1494_v36, %v851_v60 }
0x1092   :  { %v860_v10 = vsel %vm857_vm3, %v859_v3, %v855_v1 }
0x1093   :  { %v863_v15 = vmul.f32 0.0, %v860_v10 }
0x10f0   :  { %v866_v9 = vpop.permute.xlu1 %865 }
0x10f1   :  { %v868_v12 = vmul.f32 %v866_v9, %v860_v10 }
0x10f3   :  { %870 = vrot.lane.b32.xlu2 %v868_v12, %s1589_s3 }
0x10fb   :  { %776 = vrot.lane.b32.xlu2 %v1496_v13, %s1588_s2 }
0x114d   :  { %v871_v17 = vpop.permute.xlu2 %870 }
0x114e   :  { %v1915_v18 = vadd.f32 %v871_v17, %v863_v15 }
0x1150   :  { %1497 = vtanh.f32 %v1915_v18 }
0x1151   :  { %1499 = vpow2.f32 %v1408_v19 }
0x1155   :  { %v777_v29 = vpop.permute.xlu2 %776 }
0x1156   :  { %v1498_v8 = vpop.eup %1497 }
0x1157   :  { %876 = vrot.lane.b32.xlu0 %v1498_v8, %s1588_s2  ;;  %v1500_v20 = vpop.eup %1499 }
0x1158   :  { %v757_v0 = vadd.f32 1.0, %v1500_v20 }
0x115a   :  { %1501 = vrcp.f32 %v757_v0  ;;  %v769_v25 = vand.u32 2147483648, %v757_v0  ;;  %vm763_vm6 = vweird.f32 %v757_v0  ;;  %v767_v26 = vand.u32 2147483647, %v757_v0 }
0x115c   :  { %v770_v28 = vor.u32 1.1754944e-38, %v769_v25  ;;  %vm768_vm8 = vcmp.eq.f32.partialorder %v767_v26, 8.507059e+37 }
0x1160   :  { %v1502_v2 = vpop.eup %1501 }
0x1161   :  { %v759_v21 = vmul.f32 %v1502_v2, %v757_v0  ;;  %vm764_vm4 = vweird.f32 %v1502_v2 }
0x1162   :  { %vm765_vm7 = vmor %vm763_vm6, %vm764_vm4 }
0x1163   :  { %v760_v22 = vsub.f32 1.0, %v759_v21 }
0x1165   :  { %v761_v5 = vmul.f32 %v1502_v2, %v760_v22 }
0x1167   :  { %v762_v24 = vadd.f32 %v1502_v2, %v761_v5 }
0x1169   :  { %v766_v27 = vsel %vm765_vm7, %v1502_v2, %v762_v24 }
0x116a   :  { %v771_v30 = vsel %vm768_vm8, %v770_v28, %v766_v27 }
0x116b   :  { %v779_v31 = vmul.f32 %v777_v29, %v771_v30  ;;  %v774_v45 = vmul.f32 %v771_v30, %v1844_v38 }
0x11c9   :  { %v877_v23 = vpop.permute.xlu0 %876 }
0x11ca   :  { %v879_v6 = vmul.f32 %v877_v23, %v860_v10 }
0x11cc   :  { %882 = vrot.lane.b32.xlu1 %v879_v6, %s1589_s3 }
0x11d4   :  { %781 = vrot.lane.b32.xlu1 %v779_v31, %s1589_s3 }
0x123e   :  { %v883_v32 = vpop.permute.xlu1 %882 }
0x123f   :  { %1411 = vmatmul.msk.f32.vlgmr.msrb.gmra.mxu3 %vm131_vm5, %v883_v32 }
0x1240   :  { %1282 = vmatpush.msrb.mxu3 %v1852_v42 }
0x1242   :  { %1283 = vmatpush.msrb.mxu3 %v1857_v43 }
0x1244   :  { %1284 = vmatpush.msrb.mxu3 %v1867_v47 }
0x1246   :  { %1285 = vmatpush.msrb.mxu3 %v1875_v48  ;;  %v782_v41 = vpop.permute.xlu1 %781 }
0x1247   :  { %v784_v49 = vadd.f32 %v782_v41, %v774_v45 }
0x12c2   :  { %v903_v39 = vpop.f32.mrf.mxu3 }
0x12c3   :  { %v906_v40 = vadd.f32 %v903_v39, %v304_v37  ;;  %v474_v39 = vadd.f32 %v1905_v51, %v1826_v46 }
0x12c5   :  { %1503 = vtanh.f32 %v906_v40  ;;  %v1412_v7 = vmul.f32 -1.442695, %v906_v40 }
0x12c6   :  { %1505 = vtanh.f32 %v784_v49 }
0x12c7   :  { %1507 = vpow2.f32 %v1412_v7 }
0x12cb   :  { %v1504_v52 = vpop.eup %1503 }
0x12cc   :  { %929 = vrot.lane.b32.xlu0 %v1504_v52, %s1588_s2  ;;  %v1506_v33 = vpop.eup %1505 }
0x12cd   :  { %v1508_v53 = vpop.eup %1507 }
0x12ce   :  { %v910_v34 = vadd.f32 1.0, %v1508_v53 }
0x12d0   :  { %1509 = vrcp.f32 %v910_v34  ;;  %v922_v38 = vand.u32 2147483648, %v910_v34  ;;  %vm916_vm10 = vweird.f32 %v910_v34  ;;  %v920_v56 = vand.u32 2147483647, %v910_v34 }
0x12d2   :  { %v923_v59 = vor.u32 1.1754944e-38, %v922_v38  ;;  %vm921_vm12 = vcmp.eq.f32.partialorder %v920_v56, 8.507059e+37 }
0x12d4   :  { %787 = vrot.lane.b32.xlu0 %v1506_v33, %s1588_s2 }
0x12d6   :  { %v1510_v44 = vpop.eup %1509 }
0x12d7   :  { %v912_v35 = vmul.f32 %v1510_v44, %v910_v34  ;;  %vm917_vm9 = vweird.f32 %v1510_v44 }
0x12d8   :  { %vm918_vm11 = vmor %vm916_vm10, %vm917_vm9 }
0x12d9   :  { %v913_v54 = vsub.f32 1.0, %v912_v35 }
0x12db   :  { %v914_v36 = vmul.f32 %v1510_v44, %v913_v54 }
0x12dd   :  { %v915_v55 = vadd.f32 %v1510_v44, %v914_v36 }
0x12df   :  { %v919_v58 = vsel %vm918_vm11, %v1510_v44, %v915_v55 }
0x12e0   :  { %v924_v11 = vsel %vm921_vm12, %v923_v59, %v919_v58 }
0x12e1   :  { %v927_v1 = vmul.f32 %v924_v11, %v1915_v18  ;;  %v389_v18 = vadd.f32 %v1905_v51, %v1809_v16 }
0x133e   :  { %v930_v60 = vpop.permute.xlu0 %929 }
0x133f   :  { %v932_v61 = vmul.f32 %v930_v60, %v924_v11 }
0x1341   :  { %934 = vrot.lane.b32.xlu2 %v932_v61, %s1589_s3 }
0x1346   :  { %v788_v62 = vpop.permute.xlu0 %787 }
0x1347   :  { %v790_v63 = vmul.f32 %v788_v62, %v771_v30 }
0x1349   :  { %792 = vrot.lane.b32.xlu2 %v790_v63, %s1589_s3 }
0x139b   :  { %v935_v3 = vpop.permute.xlu2 %934 }
0x139c   :  { %v937_v4 = vadd.f32 %v935_v3, %v927_v1  ;;  %v559_v3 = vadd.f32 %v1905_v51, %v1839_v14 }
0x139e   :  { %1511 = vtanh.f32 %v937_v4 }
0x13a3   :  { %v793_v9 = vpop.permute.xlu2 %792 }
0x13a4   :  { %v1512_v10 = vpop.eup %1511  ;;  %1409 = vmatmul.msk.f32.vlgmr.msrb.gmra.mxu1 %vm131_vm5, %v793_v9 }
0x13a5   :  { %940 = vrot.lane.b32.xlu1 %v1512_v10, %s1588_s2  ;;  %1154 = vmatpush.msrb.mxu1 %v1852_v42 }
0x13a7   :  { %1155 = vmatpush.msrb.mxu1 %v1857_v43 }
0x13a9   :  { %1156 = vmatpush.msrb.mxu1 %v1867_v47 }
0x13ab   :  { %1157 = vmatpush.msrb.mxu1 %v1875_v48 }
0x1417   :  { %v941_v12 = vpop.permute.xlu1 %940 }
0x1418   :  { %v943_v13 = vmul.f32 %v941_v12, %v924_v11 }
0x141a   :  { %946 = vrot.lane.b32.xlu0 %v943_v13, %s1589_s3 }
0x1421   :  { %v1942_v17 = vpop.f32.mrf.mxu1 }
0x148c   :  { %v947_v15 = vpop.permute.xlu0 %946 }
0x148d   :  { %1413 = vmatmul.msk.f32.vlgmr.msra.gmra.mxu1 %vm131_vm5, %v947_v15 }
0x150a   :  { %v967_v8 = vpop.f32.mrf.mxu1 }
0x150b   :  { %v970_v42 = vadd.f32 %v967_v8, %v389_v18 }
0x150d   :  { %1513 = vtanh.f32 %v970_v42  ;;  %v1414_v47 = vmul.f32 -1.442695, %v970_v42 }
0x150f   :  { %1515 = vpow2.f32 %v1414_v47 }
0x1513   :  { %v1514_v43 = vpop.eup %1513 }
0x1514   :  { %993 = vrot.lane.b32.xlu1 %v1514_v43, %s1588_s2 }
0x1515   :  { %v1516_v48 = vpop.eup %1515 }
0x1516   :  { %v974_v19 = vadd.f32 1.0, %v1516_v48 }
0x1518   :  { %1517 = vrcp.f32 %v974_v19  ;;  %v986_v5 = vand.u32 2147483648, %v974_v19  ;;  %vm980_vm14 = vweird.f32 %v974_v19  ;;  %v984_v16 = vand.u32 2147483647, %v974_v19 }
0x151a   :  { %v987_v24 = vor.u32 1.1754944e-38, %v986_v5  ;;  %vm985_vm0 = vcmp.eq.f32.partialorder %v984_v16, 8.507059e+37 }
0x151e   :  { %v1518_v20 = vpop.eup %1517 }
0x151f   :  { %v976_v0 = vmul.f32 %v1518_v20, %v974_v19  ;;  %vm981_vm13 = vweird.f32 %v1518_v20 }
0x1520   :  { %vm982_vm15 = vmor %vm980_vm14, %vm981_vm13 }
0x1521   :  { %v977_v2 = vsub.f32 1.0, %v976_v0 }
0x1523   :  { %v978_v21 = vmul.f32 %v1518_v20, %v977_v2 }
0x1525   :  { %v979_v22 = vadd.f32 %v1518_v20, %v978_v21 }
0x1527   :  { %v983_v23 = vsel %vm982_vm15, %v1518_v20, %v979_v22 }
0x1528   :  { %v988_v25 = vsel %vm985_vm0, %v987_v24, %v983_v23 }
0x1529   :  { %v991_v27 = vmul.f32 %v988_v25, %v937_v4 }
0x1586   :  { %v994_v6 = vpop.permute.xlu1 %993 }
0x1587   :  { %v996_v26 = vmul.f32 %v994_v6, %v988_v25 }
0x1589   :  { %998 = vrot.lane.b32.xlu2 %v996_v26, %s1589_s3  ;;  %v644_v26 = vadd.f32 %v1905_v51, %v1910_v57 }
0x15e3   :  { %v999_v28 = vpop.permute.xlu2 %998 }
0x15e4   :  { %v1001_v29 = vadd.f32 %v999_v28, %v991_v27 }
0x15e6   :  { %1519 = vtanh.f32 %v1001_v29 }
0x15ec   :  { %v1520_v30 = vpop.eup %1519 }
0x15ed   :  { %1004 = vrot.lane.b32.xlu0 %v1520_v30, %s1588_s2 }
0x165f   :  { %v1005_v31 = vpop.permute.xlu0 %1004 }
0x1660   :  { %v1007_v32 = vmul.f32 %v1005_v31, %v988_v25 }
0x1662   :  { %1010 = vrot.lane.b32.xlu1 %v1007_v32, %s1589_s3 }
0x16d4   :  { %v1011_v37 = vpop.permute.xlu1 %1010 }
0x16d5   :  { %1415 = vmatmul.msk.f32.vlgmr.msra.gmra.mxu2 %vm131_vm5, %v1011_v37 }
0x1758   :  { %v1031_v40 = vpop.f32.mrf.mxu2 }
0x1759   :  { %v1034_v41 = vadd.f32 %v1031_v40, %v474_v39 }
0x175b   :  { %1521 = vtanh.f32 %v1034_v41  ;;  %v1416_v49 = vmul.f32 -1.442695, %v1034_v41 }
0x175d   :  { %1523 = vpow2.f32 %v1416_v49 }
0x1761   :  { %v1522_v45 = vpop.eup %1521 }
0x1762   :  { %1057 = vrot.lane.b32.xlu2 %v1522_v45, %s1588_s2 }
0x1763   :  { %v1524_v52 = vpop.eup %1523 }
0x1764   :  { %v1038_v33 = vadd.f32 1.0, %v1524_v52 }
0x1766   :  { %1525 = vrcp.f32 %v1038_v33  ;;  %v1050_v54 = vand.u32 2147483648, %v1038_v33  ;;  %vm1044_vm2 = vweird.f32 %v1038_v33  ;;  %v1048_v46 = vand.u32 2147483647, %v1038_v33 }
0x1768   :  { %v1051_v55 = vor.u32 1.1754944e-38, %v1050_v54  ;;  %vm1049_vm4 = vcmp.eq.f32.partialorder %v1048_v46, 8.507059e+37 }
0x176c   :  { %v1526_v7 = vpop.eup %1525 }
0x176d   :  { %v1040_v53 = vmul.f32 %v1526_v7, %v1038_v33  ;;  %vm1045_vm1 = vweird.f32 %v1526_v7 }
0x176e   :  { %vm1046_vm3 = vmor %vm1044_vm2, %vm1045_vm1 }
0x176f   :  { %v1041_v34 = vsub.f32 1.0, %v1040_v53 }
0x1771   :  { %v1042_v44 = vmul.f32 %v1526_v7, %v1041_v34 }
0x1773   :  { %v1043_v35 = vadd.f32 %v1526_v7, %v1042_v44 }
0x1775   :  { %v1047_v36 = vsel %vm1046_vm3, %v1526_v7, %v1043_v35 }
0x1776   :  { %v1052_v56 = vsel %vm1049_vm4, %v1051_v55, %v1047_v36 }
0x1777   :  { %v1055_v59 = vmul.f32 %v1052_v56, %v1001_v29 }
0x17bc   :  { %v1058_v38 = vpop.permute.xlu2 %1057 }
0x17bd   :  { %v1060_v58 = vmul.f32 %v1058_v38, %v1052_v56 }
0x17bf   :  { %1062 = vrot.lane.b32.xlu0 %v1060_v58, %s1589_s3 }
0x1831   :  { %v1063_v60 = vpop.permute.xlu0 %1062 }
0x1832   :  { %v1065_v11 = vadd.f32 %v1063_v60, %v1055_v59 }
0x1834   :  { %1527 = vtanh.f32 %v1065_v11 }
0x183a   :  { %v1528_v61 = vpop.eup %1527 }
0x183b   :  { %1068 = vrot.lane.b32.xlu1 %v1528_v61, %s1588_s2 }
0x18ad   :  { %v1069_v62 = vpop.permute.xlu1 %1068 }
0x18ae   :  { %v1071_v63 = vmul.f32 %v1069_v62, %v1052_v56  ;;  %v729_v56 = vadd.f32 %v1905_v51, %v1900_v50 }
0x18b0   :  { %1074 = vrot.lane.b32.xlu2 %v1071_v63, %s1589_s3 }
0x190a   :  { %v1075_v1 = vpop.permute.xlu2 %1074 }
0x190b   :  { %1417 = vmatmul.msk.f32.vlgmr.msra.gmra.mxu3 %vm131_vm5, %v1075_v1 }
0x198e   :  { %v1095_v4 = vpop.f32.mrf.mxu3 }
0x198f   :  { %v1098_v9 = vadd.f32 %v1095_v4, %v559_v3 }
0x1991   :  { %1529 = vtanh.f32 %v1098_v9  ;;  %v1418_v12 = vmul.f32 -1.442695, %v1098_v9 }
0x1993   :  { %1531 = vpow2.f32 %v1418_v12 }
0x1997   :  { %v1530_v10 = vpop.eup %1529 }
0x1998   :  { %1121 = vrot.lane.b32.xlu0 %v1530_v10, %s1588_s2 }
0x1999   :  { %v1532_v13 = vpop.eup %1531 }
0x199a   :  { %v1102_v15 = vadd.f32 1.0, %v1532_v13 }
0x199c   :  { %1533 = vrcp.f32 %v1102_v15  ;;  %v1114_v48 = vand.u32 2147483648, %v1102_v15  ;;  %vm1108_vm7 = vweird.f32 %v1102_v15  ;;  %v1112_v14 = vand.u32 2147483647, %v1102_v15 }
0x199e   :  { %v1115_v20 = vor.u32 1.1754944e-38, %v1114_v48  ;;  %vm1113_vm9 = vcmp.eq.f32.partialorder %v1112_v14, 8.507059e+37 }
0x19a2   :  { %v1534_v18 = vpop.eup %1533 }
0x19a3   :  { %v1104_v8 = vmul.f32 %v1534_v18, %v1102_v15  ;;  %vm1109_vm6 = vweird.f32 %v1534_v18 }
0x19a4   :  { %vm1110_vm8 = vmor %vm1108_vm7, %vm1109_vm6  ;;  %vm1361_vm7 = vcmask 64512  }
0x19a5   :  { %v1105_v42 = vsub.f32 1.0, %v1104_v8 }
0x19a7   :  { %v1106_v43 = vmul.f32 %v1534_v18, %v1105_v42 }
0x19a9   :  { %v1107_v47 = vadd.f32 %v1534_v18, %v1106_v43 }
0x19ab   :  { %v1111_v19 = vsel %vm1110_vm8, %v1534_v18, %v1107_v47 }
0x19ac   :  { %v1116_v2 = vsel %vm1113_vm9, %v1115_v20, %v1111_v19 }
0x19ad   :  { %v1119_v22 = vmul.f32 %v1116_v2, %v1065_v11 }
0x1a0a   :  { %v1122_v0 = vpop.permute.xlu0 %1121 }
0x1a0b   :  { %v1124_v21 = vmul.f32 %v1122_v0, %v1116_v2  ;;  %v814_v0 = vadd.f32 %v1905_v51, %v1942_v17 }
0x1a0d   :  { %1126 = vrot.lane.b32.xlu1 %v1124_v21, %s1589_s3 }
0x1a7f   :  { %v1127_v5 = vpop.permute.xlu1 %1126 }
0x1a80   :  { %v1129_v16 = vadd.f32 %v1127_v5, %v1119_v22 }
0x1a82   :  { %1535 = vtanh.f32 %v1129_v16 }
0x1a88   :  { %v1536_v23 = vpop.eup %1535 }
0x1a89   :  { %1132 = vrot.lane.b32.xlu2 %v1536_v23, %s1588_s2 }
0x1ae3   :  { %v1133_v24 = vpop.permute.xlu2 %1132 }
0x1ae4   :  { %v1135_v6 = vmul.f32 %v1133_v24, %v1116_v2 }
0x1ae6   :  { %1138 = vrot.lane.b32.xlu0 %v1135_v6, %s1589_s3 }
0x1b58   :  { %v1139_v25 = vpop.permute.xlu0 %1138 }
0x1b59   :  { %1419 = vmatmul.msk.f32.vlgmr.msrb.gmra.mxu1 %vm131_vm5, %v1139_v25 }
0x1bd6   :  { %v1159_v27 = vpop.f32.mrf.mxu1 }
0x1bd7   :  { %v1162_v28 = vadd.f32 %v1159_v27, %v644_v26 }
0x1bd9   :  { %1537 = vtanh.f32 %v1162_v28  ;;  %v1420_v30 = vmul.f32 -1.442695, %v1162_v28 }
0x1bdb   :  { %1539 = vpow2.f32 %v1420_v30 }
0x1bdf   :  { %v1538_v29 = vpop.eup %1537 }
0x1be0   :  { %1185 = vrot.lane.b32.xlu1 %v1538_v29, %s1588_s2 }
0x1be1   :  { %v1540_v31 = vpop.eup %1539 }
0x1be2   :  { %v1166_v32 = vadd.f32 1.0, %v1540_v31 }
0x1be4   :  { %1541 = vrcp.f32 %v1166_v32  ;;  %v1178_v49 = vand.u32 2147483648, %v1166_v32  ;;  %vm1172_vm11 = vweird.f32 %v1166_v32  ;;  %v1176_v57 = vand.u32 2147483647, %v1166_v32 }
0x1be6   :  { %v1179_v33 = vor.u32 1.1754944e-38, %v1178_v49  ;;  %vm1177_vm13 = vcmp.eq.f32.partialorder %v1176_v57, 8.507059e+37  ;;  %v1330_v49 = vld [vmem:[%s2011_s7 + $0x10] sm:$0xff]  ;;  %v1329_v57 = vld [vmem:[%s2011_s7 + $0x8] sm:$0xff] }
0x1bea   :  { %v1542_v37 = vpop.eup %1541 }
0x1beb   :  { %v1168_v39 = vmul.f32 %v1542_v37, %v1166_v32  ;;  %vm1173_vm10 = vweird.f32 %v1542_v37 }
0x1bec   :  { %vm1174_vm12 = vmor %vm1172_vm11, %vm1173_vm10 }
0x1bed   :  { %v1169_v40 = vsub.f32 1.0, %v1168_v39 }
0x1bef   :  { %v1170_v41 = vmul.f32 %v1542_v37, %v1169_v40 }
0x1bf1   :  { %v1171_v45 = vadd.f32 %v1542_v37, %v1170_v41 }
0x1bf3   :  { %v1175_v52 = vsel %vm1174_vm12, %v1542_v37, %v1171_v45  ;;  %v1331_v45 = vld [vmem:[%s2011_s7 + $0x18] sm:$0xff] }
0x1bf4   :  { %v1180_v53 = vsel %vm1177_vm13, %v1179_v33, %v1175_v52  ;;  %1353 = vmatpush.msrb.mxu0 %v1331_v45  ;;  %v1328_v52 = vld [vmem:[%s2011_s7] sm:$0xff] }
0x1bf5   :  { %v1183_v44 = vmul.f32 %v1180_v53, %v1129_v16 }
0x1bf6   :  { %1354 = vmatpush.msrb.mxu0 %v1330_v49 }
0x1bf8   :  { %1355 = vmatpush.msrb.mxu0 %v1329_v57 }
0x1bfa   :  { %1356 = vmatpush.msrb.mxu0 %v1328_v52 }
0x1c52   :  { %v1186_v7 = vpop.permute.xlu1 %1185 }
0x1c53   :  { %v1188_v34 = vmul.f32 %v1186_v7, %v1180_v53 }
0x1c55   :  { %1190 = vrot.lane.b32.xlu2 %v1188_v34, %s1589_s3  ;;  %v1432_v34 = vld [vmem:[%s2012_s8] ss:$0 sm:$0xff] }
0x1caf   :  { %v1191_v35 = vpop.permute.xlu2 %1190 }
0x1cb0   :  { %v1193_v54 = vadd.f32 %v1191_v35, %v1183_v44 }
0x1cb2   :  { %1543 = vtanh.f32 %v1193_v54 }
0x1cb8   :  { %v1544_v46 = vpop.eup %1543 }
0x1cb9   :  { %1196 = vrot.lane.b32.xlu0 %v1544_v46, %s1588_s2 }
0x1d2b   :  { %v1197_v36 = vpop.permute.xlu0 %1196 }
0x1d2c   :  { %v1199_v55 = vmul.f32 %v1197_v36, %v1180_v53 }
0x1d2e   :  { %1202 = vrot.lane.b32.xlu1 %v1199_v55, %s1589_s3 }
0x1da0   :  { %v1203_v38 = vpop.permute.xlu1 %1202 }
0x1da1   :  { %1421 = vmatmul.msk.f32.vlgmr.msrb.gmra.mxu2 %vm131_vm5, %v1203_v38 }
0x1e24   :  { %v1223_v58 = vpop.f32.mrf.mxu2 }
0x1e25   :  { %v1226_v59 = vadd.f32 %v1223_v58, %v729_v56 }
0x1e27   :  { %1545 = vtanh.f32 %v1226_v59  ;;  %v1422_v11 = vmul.f32 -1.442695, %v1226_v59 }
0x1e29   :  { %1547 = vpow2.f32 %v1422_v11 }
0x1e2d   :  { %v1546_v60 = vpop.eup %1545 }
0x1e2e   :  { %1249 = vrot.lane.b32.xlu2 %v1546_v60, %s1588_s2 }
0x1e2f   :  { %v1548_v61 = vpop.eup %1547 }
0x1e30   :  { %v1230_v62 = vadd.f32 1.0, %v1548_v61 }
0x1e32   :  { %1549 = vrcp.f32 %v1230_v62  ;;  %v1242_v10 = vand.u32 2147483648, %v1230_v62  ;;  %vm1236_vm15 = vweird.f32 %v1230_v62  ;;  %v1240_v50 = vand.u32 2147483647, %v1230_v62 }
0x1e34   :  { %v1243_v13 = vor.u32 1.1754944e-38, %v1242_v10  ;;  %vm1241_vm1 = vcmp.eq.f32.partialorder %v1240_v50, 8.507059e+37 }
0x1e38   :  { %v1550_v63 = vpop.eup %1549 }
0x1e39   :  { %v1232_v1 = vmul.f32 %v1550_v63, %v1230_v62  ;;  %vm1237_vm14 = vweird.f32 %v1550_v63 }
0x1e3a   :  { %vm1238_vm0 = vmor %vm1236_vm15, %vm1237_vm14 }
0x1e3b   :  { %v1233_v3 = vsub.f32 1.0, %v1232_v1 }
0x1e3d   :  { %v1234_v4 = vmul.f32 %v1550_v63, %v1233_v3 }
0x1e3f   :  { %v1235_v9 = vadd.f32 %v1550_v63, %v1234_v4 }
0x1e41   :  { %v1239_v12 = vsel %vm1238_vm0, %v1550_v63, %v1235_v9 }
0x1e42   :  { %v1244_v18 = vsel %vm1241_vm1, %v1243_v13, %v1239_v12 }
0x1e43   :  { %v1247_v42 = vmul.f32 %v1244_v18, %v1193_v54 }
0x1e88   :  { %v1250_v15 = vpop.permute.xlu2 %1249 }
0x1e89   :  { %v1252_v8 = vmul.f32 %v1250_v15, %v1244_v18 }
0x1e8b   :  { %1254 = vrot.lane.b32.xlu0 %v1252_v8, %s1589_s3 }
0x1efd   :  { %v1255_v43 = vpop.permute.xlu0 %1254 }
0x1efe   :  { %v1257_v47 = vadd.f32 %v1255_v43, %v1247_v42 }
0x1f00   :  { %1551 = vtanh.f32 %v1257_v47 }
0x1f06   :  { %v1552_v48 = vpop.eup %1551 }
0x1f07   :  { %1260 = vrot.lane.b32.xlu1 %v1552_v48, %s1588_s2 }
0x1f79   :  { %v1261_v14 = vpop.permute.xlu1 %1260 }
0x1f7a   :  { %v1263_v19 = vmul.f32 %v1261_v14, %v1244_v18 }
0x1f7c   :  { %1266 = vrot.lane.b32.xlu2 %v1263_v19, %s1589_s3 }
0x1fd6   :  { %v1267_v20 = vpop.permute.xlu2 %1266 }
0x1fd7   :  { %1423 = vmatmul.msk.f32.vlgmr.msrb.gmra.mxu3 %vm131_vm5, %v1267_v20 }
0x205a   :  { %v1287_v2 = vpop.f32.mrf.mxu3 }
0x205b   :  { %v1290_v21 = vadd.f32 %v1287_v2, %v814_v0 }
0x205d   :  { %1553 = vtanh.f32 %v1290_v21  ;;  %v1424_v5 = vmul.f32 -1.442695, %v1290_v21 }
0x205f   :  { %1555 = vpow2.f32 %v1424_v5 }
0x2063   :  { %v1554_v22 = vpop.eup %1553 }
0x2064   :  { %1313 = vrot.lane.b32.xlu0 %v1554_v22, %s1588_s2 }
0x2065   :  { %v1556_v16 = vpop.eup %1555 }
0x2066   :  { %v1294_v23 = vadd.f32 1.0, %v1556_v16 }
0x2068   :  { %1557 = vrcp.f32 %v1294_v23  ;;  %v1306_v28 = vand.u32 2147483648, %v1294_v23  ;;  %vm1300_vm3 = vweird.f32 %v1294_v23  ;;  %v1304_v51 = vand.u32 2147483647, %v1294_v23 }
0x206a   :  { %v1307_v29 = vor.u32 1.1754944e-38, %v1306_v28  ;;  %vm1305_vm6 = vcmp.eq.f32.partialorder %v1304_v51, 8.507059e+37 }
0x206e   :  { %v1558_v24 = vpop.eup %1557 }
0x206f   :  { %v1296_v6 = vmul.f32 %v1558_v24, %v1294_v23  ;;  %vm1301_vm2 = vweird.f32 %v1558_v24 }
0x2070   :  { %vm1302_vm4 = vmor %vm1300_vm3, %vm1301_vm2 }
0x2071   :  { %v1297_v25 = vsub.f32 1.0, %v1296_v6 }
0x2073   :  { %v1298_v26 = vmul.f32 %v1558_v24, %v1297_v25 }
0x2075   :  { %v1299_v27 = vadd.f32 %v1558_v24, %v1298_v26 }
0x2077   :  { %v1303_v17 = vsel %vm1302_vm4, %v1558_v24, %v1299_v27 }
0x2078   :  { %v1308_v31 = vsel %vm1305_vm6, %v1307_v29, %v1303_v17 }
0x2079   :  { %v1311_v37 = vmul.f32 %v1308_v31, %v1257_v47 }
0x20d6   :  { %v1314_v30 = vpop.permute.xlu0 %1313 }
0x20d7   :  { %v1316_v32 = vmul.f32 %v1314_v30, %v1308_v31 }
0x20d9   :  { %1318 = vrot.lane.b32.xlu1 %v1316_v32, %s1589_s3 }
0x214b   :  { %v1319_v39 = vpop.permute.xlu1 %1318 }
0x214c   :  { %v1321_v40 = vadd.f32 %v1319_v39, %v1311_v37 }
0x214e   :  { %1559 = vtanh.f32 %v1321_v40 }
0x2154   :  { %v1560_v41 = vpop.eup %1559 }
0x2155   :  { %1324 = vrot.lane.b32.xlu2 %v1560_v41, %s1588_s2 }
0x21af   :  { %v1325_v33 = vpop.permute.xlu2 %1324 }
0x21b0   :  { %v1327_v7 = vmul.f32 %v1325_v33, %v1308_v31 }
0x21b2   :  { %1337 = vrot.lane.b32.xlu0 %v1327_v7, %s1589_s3 }
0x2224   :  { %v1338_v53 = vpop.permute.xlu0 %1337 }
0x2225   :  { %1425 = vmatmul.msk.f32.vlgmr.msrb.gmra.mxu0 %vm131_vm5, %v1338_v53 }
0x22a2   :  { %v1358_v44 = vpop.f32.mrf.mxu0 }
0x22a3   :  { %v1359_v35 = vadd.f32 %v1432_v34, %v1358_v44 }
0x22a5   :  { %1362 = vst.msk [vmem:[#allocation3] sm:$0xff] %vm1361_vm7, %v1359_v35 }
0x22a6   :  { %1373 = dma.vmem_to_hbm [thread:$0]  %s1369_s18, 128, %s1371_s21, [#allocation4]  }
0x22a7   :  { %1585 = dma.done.wait [#allocation4], 128  }
0x22a8   :  { %1586 = vsyncadd [#allocation4], 4294967168 }
0x22a9   :  { %1378 = vsyncpa [#allocation4], 1 }

</bundles_post_ra>
